<compile_context>
chip_gen: v7x
topology: tpu7x:2x2x1
jax: 0.10.0
libtpu: 0.0.40
codegen_flags: <defaults>
</compile_context>

<pallas_src>
import jax
import jax.numpy as jnp
from jax.experimental import pallas as pl
from jax.experimental.pallas import tpu as pltpu

IN_FEATURES = 784      # 1 * 28 * 28  (K of layer 1, kept unpadded)
HIDDEN = 784
OUT_FEATURES = 10

HID_PAD = 896          # 7 * 128  (padded hidden: N of layer 1 / K of layer 2)
OUT_PAD = 128          # padded class dim (lane-dense output store)

_SMALL_BATCH_MAX = 128  # <= this: grid-less single-block path
_BM_MAX = 512           # max batch tile for the gridded (pipelined) path

_NEG_BIG = -1e30        # mask value for padded class lanes


def _mlp_softmax_kernel(x_ref, w1_ref, b1_ref, w2_ref, b2_ref, o_ref):
    # x:  (BM, 784) f32    w1: (784, 896) bf16   b1: (1, 896) f32
    # w2: (896, 128) bf16  b2: (1, 128)  f32     out: (BM, 128) f32
    #
    # Flatten->cast is fused here: raw f32 rows in, bf16 fed to the MXU.
    x = x_ref[...].astype(jnp.bfloat16)

    # Layer 1: bf16 MXU matmul (K=784 unpadded), f32 accumulation;
    # f32 bias + ReLU epilogue (portable across v5e/v6e/v7x).
    h = jnp.dot(x, w1_ref[...], preferred_element_type=jnp.float32)
    h = jnp.maximum(h + b1_ref[...], 0.0)                     # (BM, 896) f32

    # Layer 2: cast activations to bf16 for the MXU, accumulate in f32.
    z = jnp.dot(h.astype(jnp.bfloat16), w2_ref[...],
                preferred_element_type=jnp.float32)
    z = jnp.maximum(z + b2_ref[...], 0.0)                     # (BM, 128) f32

    # Mask padded class lanes (10..127) so they vanish in the softmax.
    lane = jax.lax.broadcasted_iota(jnp.int32, z.shape, dimension=1)
    z = jnp.where(lane < OUT_FEATURES, z, _NEG_BIG)

    # Numerically stable row-wise softmax; reciprocal on the EUP (approx)
    # plus one Newton refinement -> near-f32 accuracy, divide off the VPU.
    m = jnp.max(z, axis=-1, keepdims=True)
    e = jnp.exp(z - m)
    s = jnp.sum(e, axis=-1, keepdims=True)
    inv = pl.reciprocal(s, approx=True)
    inv = inv * (2.0 - s * inv)
    o_ref[...] = e * inv


def prepare_params(w1_t, b1, w2_t, b2):
    """One-time host-side prep.  Weights stored as (in, out).

    W1: (784, 784) -> (784, 896) bf16   (K unpadded, N padded to 7*128)
    W2: (784, 10)  -> (896, 128) bf16   (K padded to match hidden, N to 128)
    Zero padding preserves the math (padded hidden cols give ReLU(0+0)=0 and
    the matching W2 rows are zero; padded class lanes are masked pre-softmax).
    """
    w1p = jnp.pad(w1_t.astype(jnp.float32),
                  ((0, 0), (0, HID_PAD - HIDDEN))).astype(jnp.bfloat16)
    b1p = jnp.pad(b1.astype(jnp.float32),
                  (0, HID_PAD - HIDDEN)).reshape(1, HID_PAD)
    w2p = jnp.pad(w2_t.astype(jnp.float32),
                  ((0, HID_PAD - HIDDEN), (0, OUT_PAD - OUT_FEATURES))
                  ).astype(jnp.bfloat16)
    b2p = jnp.pad(b2.astype(jnp.float32),
                  (0, OUT_PAD - OUT_FEATURES)).reshape(1, OUT_PAD)
    return w1p, b1p, w2p, b2p


def _round_up(x, m):
    return ((x + m - 1) // m) * m


def net_mcc_forward(x_nchw, params):
    """x_nchw: (B, 1, 28, 28) f32.  params = prepare_params(...).
    Returns (B, 10) softmax probabilities (f32)."""
    w1p, b1p, w2p, b2p = params
    B = x_nchw.shape[0]

    # Flatten only (free reshape, identical to torch.nn.Flatten on NCHW).
    # No pad / no dtype cast here -- that is fused into the kernel.
    x2d = x_nchw.reshape(B, IN_FEATURES)

    if B <= _SMALL_BATCH_MAX:
        # Tiny batch: single full-block invocation (no grid-step overhead).
        # TODO(synk): for repeated tiny-batch inference this path is purely
        # W1-DMA-bound; keeping the ~1.6 MiB of weights resident in VMEM
        # across calls (cross-pallas_call futures) would remove that cost.
        out = pl.pallas_call(
            _mlp_softmax_kernel,
            out_shape=jax.ShapeDtypeStruct((B, OUT_PAD), jnp.float32),
            in_specs=[pl.BlockSpec(memory_space=pltpu.MemorySpace.VMEM)] * 5,
            out_specs=pl.BlockSpec(memory_space=pltpu.MemorySpace.VMEM),
        )(x2d, w1p, b1p, w2p, b2p)
        return out[:, :OUT_FEATURES]

    # Large batch: 1-D grid over batch tiles.  x/out tiles are double-buffered
    # and overlap compute; weight/bias blocks have a constant block index so
    # they are DMA'd once and stay resident.  Batch tile is capped at 512 and
    # chosen so there are always >= 2 tiles (v7x megacore splits the
    # "parallel" batch axis across both TensorCores).
    bm = min(_BM_MAX, _round_up((B + 1) // 2, 8))
    Bp = _round_up(B, bm)
    if Bp != B:
        x2d = jnp.pad(x2d, ((0, Bp - B), (0, 0)))
    out = pl.pallas_call(
        _mlp_softmax_kernel,
        out_shape=jax.ShapeDtypeStruct((Bp, OUT_PAD), jnp.float32),
        grid_spec=pltpu.PrefetchScalarGridSpec(
            num_scalar_prefetch=0,
            grid=(Bp // bm,),
            in_specs=[
                pl.BlockSpec((bm, IN_FEATURES), lambda i: (i, 0)),        # x tile
                pl.BlockSpec((IN_FEATURES, HID_PAD), lambda i: (0, 0)),   # W1 (resident)
                pl.BlockSpec((1, HID_PAD), lambda i: (0, 0)),             # b1
                pl.BlockSpec((HID_PAD, OUT_PAD), lambda i: (0, 0)),       # W2 (resident)
                pl.BlockSpec((1, OUT_PAD), lambda i: (0, 0)),             # b2
            ],
            out_specs=pl.BlockSpec((bm, OUT_PAD), lambda i: (i, 0)),
        ),
        compiler_params=pltpu.CompilerParams(
            dimension_semantics=("parallel",),
            vmem_limit_bytes=32 * 1024 * 1024),
    )(x2d, w1p, b1p, w2p, b2p)
    return out[:B, :OUT_FEATURES]


def init_params(key):
    """Deterministic init mimicking torch.nn.Linear defaults
    (uniform(-1/sqrt(fan_in), 1/sqrt(fan_in))). Weights stored as (in, out)."""
    k1, k2, k3, k4 = jax.random.split(key, 4)
    bound1 = 1.0 / jnp.sqrt(jnp.float32(IN_FEATURES))
    bound2 = 1.0 / jnp.sqrt(jnp.float32(HIDDEN))
    w1_t = jax.random.uniform(k1, (IN_FEATURES, HIDDEN), jnp.float32,
                              minval=-bound1, maxval=bound1)
    b1 = jax.random.uniform(k2, (HIDDEN,), jnp.float32,
                            minval=-bound1, maxval=bound1)
    w2_t = jax.random.uniform(k3, (HIDDEN, OUT_FEATURES), jnp.float32,
                              minval=-bound2, maxval=bound2)
    b2 = jax.random.uniform(k4, (OUT_FEATURES,), jnp.float32,
                            minval=-bound2, maxval=bound2)
    return w1_t, b1, w2_t, b2


if __name__ == "__main__":
    key = jax.random.PRNGKey(0)
    k_params, k_x = jax.random.split(key)

    # MNIST-like NCHW input implied by Linear(784, ...): (B, 1, 28, 28)
    x = jax.random.normal(k_x, (2, 1, 28, 28), jnp.float32)
    w1_t, b1, w2_t, b2 = init_params(k_params)
    params = prepare_params(w1_t, b1, w2_t, b2)       # one-time host-side prep

    out = net_mcc_forward(x, params)
    out = jax.block_until_ready(out)

    # Correctness checks vs a pure-JAX f32 reference of the PyTorch module.
    assert out.shape == (2, OUT_FEATURES)

    def ref(xn):
        xf = xn.reshape(xn.shape[0], -1)
        h = jnp.maximum(xf @ w1_t + b1, 0.0)
        z = jnp.maximum(h @ w2_t + b2, 0.0)
        return jax.nn.softmax(z, axis=1)

    r = ref(x)
    row_sums = jnp.sum(out, axis=1)
    assert bool(jnp.all(jnp.abs(row_sums - 1.0) < 1e-3))
    assert bool(jnp.max(jnp.abs(out - r)) < 5e-2)     # bf16-weight tolerance

    # Also exercise the batch-gridded (pipelined / megacore) path once.
    xb = jax.random.normal(jax.random.PRNGKey(1), (300, 1, 28, 28), jnp.float32)
    outb = jax.block_until_ready(net_mcc_forward(xb, params))
    rb = ref(xb)
    assert outb.shape == (300, OUT_FEATURES)
    assert bool(jnp.all(jnp.abs(jnp.sum(outb, axis=1) - 1.0) < 1e-3))
    assert bool(jnp.max(jnp.abs(outb - rb)) < 5e-2)

    print("KERNEL_OK")
</pallas_src>

<mosaic_0001>
module attributes {stable_mosaic.version = 11 : i64} {
  func.func @_mlp_softmax_kernel(%arg0: memref<2x784xf32, #tpu.memory_space<vmem>>, %arg1: memref<784x896xbf16, #tpu.memory_space<vmem>>, %arg2: memref<1x896xf32, #tpu.memory_space<vmem>>, %arg3: memref<896x128xbf16, #tpu.memory_space<vmem>>, %arg4: memref<1x128xf32, #tpu.memory_space<vmem>>, %arg5: memref<2x128xf32, #tpu.memory_space<vmem>>) attributes {dimension_semantics = [], scalar_prefetch = 0 : i64, scratch_operands = 0 : i64, tpu.core_type = #tpu.core_type<tc>} {
    %c0 = arith.constant 0 : index
    %c0_0 = arith.constant 0 : index
    %0 = vector.load %arg0[%c0, %c0_0] : memref<2x784xf32, #tpu.memory_space<vmem>>, vector<2x784xf32>
    %1 = arith.truncf %0 : vector<2x784xf32> to vector<2x784xbf16>
    %c0_1 = arith.constant 0 : index
    %c0_2 = arith.constant 0 : index
    %2 = vector.load %arg1[%c0_1, %c0_2] : memref<784x896xbf16, #tpu.memory_space<vmem>>, vector<784x896xbf16>
    %cst = arith.constant dense<0.000000e+00> : vector<2x896xf32>
    %3 = tpu.matmul %1, %2, %cst {dimension_numbers = #tpu.dot_dimension_numbers<[1], [0], [0], [1], [0, 0, 1, 1], [], []>} : vector<2x784xbf16>, vector<784x896xbf16>, vector<2x896xf32> -> vector<2x896xf32>
    %c0_3 = arith.constant 0 : index
    %c0_4 = arith.constant 0 : index
    %4 = vector.load %arg2[%c0_3, %c0_4] : memref<1x896xf32, #tpu.memory_space<vmem>>, vector<1x896xf32>
    %5 = vector.broadcast %4 : vector<1x896xf32> to vector<2x896xf32>
    %6 = arith.addf %3, %5 : vector<2x896xf32>
    %cst_5 = arith.constant 0.000000e+00 : f32
    %7 = vector.broadcast %cst_5 : f32 to vector<2x896xf32>
    %8 = arith.maximumf %6, %7 : vector<2x896xf32>
    %9 = arith.truncf %8 : vector<2x896xf32> to vector<2x896xbf16>
    %c0_6 = arith.constant 0 : index
    %c0_7 = arith.constant 0 : index
    %10 = vector.load %arg3[%c0_6, %c0_7] : memref<896x128xbf16, #tpu.memory_space<vmem>>, vector<896x128xbf16>
    %cst_8 = arith.constant dense<0.000000e+00> : vector<2x128xf32>
    %11 = tpu.matmul %9, %10, %cst_8 {dimension_numbers = #tpu.dot_dimension_numbers<[1], [0], [0], [1], [0, 0, 1, 1], [], []>} : vector<2x896xbf16>, vector<896x128xbf16>, vector<2x128xf32> -> vector<2x128xf32>
    %c0_9 = arith.constant 0 : index
    %c0_10 = arith.constant 0 : index
    %12 = vector.load %arg4[%c0_9, %c0_10] : memref<1x128xf32, #tpu.memory_space<vmem>>, vector<1x128xf32>
    %13 = vector.broadcast %12 : vector<1x128xf32> to vector<2x128xf32>
    %14 = arith.addf %11, %13 : vector<2x128xf32>
    %cst_11 = arith.constant 0.000000e+00 : f32
    %15 = vector.broadcast %cst_11 : f32 to vector<2x128xf32>
    %16 = arith.maximumf %14, %15 : vector<2x128xf32>
    %17 = tpu.iota {dimensions = array<i32: 1>} : vector<2x128xi32>
    %c10_i32 = arith.constant 10 : i32
    %18 = vector.broadcast %c10_i32 : i32 to vector<2x128xi32>
    %19 = arith.cmpi slt, %17, %18 : vector<2x128xi32>
    %cst_12 = arith.constant -1.000000e+30 : f32
    %20 = vector.broadcast %cst_12 : f32 to vector<2x128xf32>
    %21 = arith.select %19, %16, %20 : vector<2x128xi1>, vector<2x128xf32>
    %cst_13 = arith.constant dense<0xFF800000> : vector<2xf32>
    %22 = vector.multi_reduction <maximumf>, %21, %cst_13 [1] : vector<2x128xf32> to vector<2xf32>
    %23 = vector.shape_cast %22 : vector<2xf32> to vector<2x1xf32>
    %24 = vector.broadcast %23 : vector<2x1xf32> to vector<2x128xf32>
    %25 = arith.subf %21, %24 : vector<2x128xf32>
    %26 = math.exp %25 : vector<2x128xf32>
    %cst_14 = arith.constant dense<0.000000e+00> : vector<2xf32>
    %27 = vector.multi_reduction <add>, %26, %cst_14 [1] : vector<2x128xf32> to vector<2xf32>
    %28 = vector.shape_cast %27 : vector<2xf32> to vector<2x1xf32>
    %29 = tpu.reciprocal %28 {approx = true} : vector<2x1xf32> -> vector<2x1xf32>
    %30 = arith.mulf %28, %29 : vector<2x1xf32>
    %cst_15 = arith.constant 2.000000e+00 : f32
    %31 = vector.broadcast %cst_15 : f32 to vector<2x1xf32>
    %32 = arith.subf %31, %30 : vector<2x1xf32>
    %33 = arith.mulf %29, %32 : vector<2x1xf32>
    %34 = vector.broadcast %33 : vector<2x1xf32> to vector<2x128xf32>
    %35 = arith.mulf %26, %34 : vector<2x128xf32>
    %c0_16 = arith.constant 0 : index
    %c0_17 = arith.constant 0 : index
    %36 = vector.load %arg5[%c0_16, %c0_17] : memref<2x128xf32, #tpu.memory_space<vmem>>, vector<2x128xf32>
    tpu.vector_store %arg5[%c0_16, %c0_17], %35 {strides = array<i32>} : memref<2x128xf32, #tpu.memory_space<vmem>>, vector<2x128xf32>,
    return
  }
}

</mosaic_0001>

<bundles_post_ra>
// kernel: tpu_custom_call.1
= control target key start
LH: loop header
LB: loop body
LE: loop exit
PB: predicated region body
PF: predicated region fallthrough
CT: control target
= control target key end

     0   :  { %10 = vsyncpa [#allocation3], 0  ;;  %s5202_s0 = inlined_call_operand.hbm [shape: f32[2,784], index: 0, kind: input, shape index: {}]   ;;  %s5203_s1 = inlined_call_operand.hbm [shape: bf16[784,896], index: 1, kind: input, shape index: {}]   ;;  %s5204_s2 = inlined_call_operand.hbm [shape: f32[1,896], index: 2, kind: input, shape index: {}]   ;;  %s5205_s3 = inlined_call_operand.hbm [shape: bf16[896,128], index: 3, kind: input, shape index: {}]   ;;  %s5206_s4 = inlined_call_operand.hbm [shape: f32[1,128], index: 4, kind: input, shape index: {}]   ;;  %s5207_s5 = inlined_call_operand.hbm [shape: f32[2,128], index: 5, kind: output, shape index: {}]  }
   0x1   :  { %11 = vsyncpa [#allocation6], 0 }
   0x2   :  { %12 = vsyncpa [#allocation9], 0 }
   0x3   :  { %13 = vsyncpa [#allocation4], 0  ;;  %s4968_s18 = smov [#allocation5]   ;;  %s4828_s22 = scalar_lea.hbm %s5203_s1, 43904 }
   0x4   :  { %s29_s19 = sshll.u32 %s4968_s18, 4  ;;  %p4829_p0 = scmp.ne.s32.totalorder %s5203_s1, %s4828_s22  ;;  %s30_s19 = int_to_ptr.vmem [resolvable:$true] %s29_s19 }
   0x5   :  { %p4832_p1 = scmp.lt.u32.totalorder %s4828_s22, %s5203_s1 }
   0x7   :  { %p4834_p2 = pnand %p4832_p1, %p4829_p0 }
   0x9   :  { %4837 = shalt.err (!%p4834_p2)
}
   0xa   :  { %s4838_s27 = scalar_lea.vmem %s30_s19, 43904  ;;  %p4843_p4 = scmp.lt.s32.totalorder %s30_s19, %s30_s19 }
   0xb   :  { %p4839_p3 = scmp.ne.s32.totalorder %s30_s19, %s4838_s27  ;;  %p4844_p5 = scmp.lt.s32.totalorder %s4838_s27, %s4838_s27 }
   0xd   :  { %p4845_p6 = por %p4844_p5, %p4843_p4 }
   0xf   :  { %p4846_p7 = pnand %p4845_p6, %p4839_p3 }
  0x11   :  { %4849 = shalt.err (!%p4846_p7)
}
  0x12   :  { %s4969_s28 = smov 448   ;;  %s4970_s29 = smov 28  }
  0x13   :  { %35 = dma.hbm_to_vmem [thread:$0]  %s5203_s1, 43904, %s30_s19, [#allocation6], %s4969_s28, %s4969_s28, %s4970_s29  }
  0x14   :  { %s4971_s7 = smov [#allocation8]   ;;  %s4850_s11 = scalar_lea.hbm %s5205_s3, 7168 }
  0x15   :  { %s51_s8 = sshll.u32 %s4971_s7, 4  ;;  %p4851_p8 = scmp.ne.s32.totalorder %s5205_s3, %s4850_s11  ;;  %s52_s8 = int_to_ptr.vmem [resolvable:$true] %s51_s8 }
  0x16   :  { %p4854_p9 = scmp.lt.u32.totalorder %s4850_s11, %s5205_s3 }
  0x18   :  { %p4856_p10 = pnand %p4854_p9, %p4851_p8 }
  0x1a   :  { %4859 = shalt.err (!%p4856_p10)
}
  0x1b   :  { %s4860_s16 = scalar_lea.vmem %s52_s8, 7168  ;;  %p4865_p12 = scmp.lt.s32.totalorder %s52_s8, %s52_s8 }
  0x1c   :  { %p4861_p11 = scmp.ne.s32.totalorder %s52_s8, %s4860_s16  ;;  %p4866_p13 = scmp.lt.s32.totalorder %s4860_s16, %s4860_s16 }
  0x1e   :  { %p4867_p0 = por %p4866_p13, %p4865_p12 }
  0x20   :  { %p4868_p1 = pnand %p4867_p0, %p4861_p11 }
  0x22   :  { %4871 = shalt.err (!%p4868_p1)
}
  0x23   :  { %s4972_s1 = smov 64   ;;  %s4973_s17 = smov 4  }
  0x24   :  { %57 = dma.hbm_to_vmem [thread:$0]  %s5205_s3, 7168, %s52_s8, [#allocation9], %s4972_s1, %s4972_s1, %s4973_s17  }
  0x25   :  { %s4974_s20 = smov [#allocation2]   ;;  %s4975_s22 = smov [#allocation7]  }
  0x26   :  { %s20_s21 = sshll.u32 %s4974_s20, 4  ;;  %s42_s23 = sshll.u32 %s4975_s22, 4  ;;  %s21_s21 = int_to_ptr.vmem [resolvable:$true] %s20_s21  ;;  %s43_s23 = int_to_ptr.vmem [resolvable:$true] %s42_s23 }
  0x27   :  { %s4872_s26 = scalar_lea.hbm %s5202_s0, 224 }
  0x28   :  { %p4873_p2 = scmp.ne.s32.totalorder %s5202_s0, %s4872_s26  ;;  %p4876_p3 = scmp.lt.u32.totalorder %s4872_s26, %s5202_s0 }
  0x2a   :  { %p4878_p4 = pnand %p4876_p3, %p4873_p2 }
  0x2c   :  { %4881 = shalt.err (!%p4878_p4)
}
  0x2d   :  { %s4882_s3 = scalar_lea.vmem %s21_s21, 224  ;;  %p4887_p6 = scmp.lt.s32.totalorder %s21_s21, %s21_s21 }
  0x2e   :  { %p4883_p5 = scmp.ne.s32.totalorder %s21_s21, %s4882_s3  ;;  %p4888_p7 = scmp.lt.s32.totalorder %s4882_s3, %s4882_s3 }
  0x30   :  { %p4889_p8 = por %p4888_p7, %p4887_p6 }
  0x32   :  { %p4890_p9 = pnand %p4889_p8, %p4883_p5 }
  0x34   :  { %4893 = shalt.err (!%p4890_p9)
}
  0x35   :  { %23 = dma.hbm_to_vmem [thread:$0]  %s5202_s0, 224, %s21_s21, [#allocation3]  }
  0x36   :  { %s4894_s10 = scalar_lea.hbm %s5204_s2, 112 }
  0x37   :  { %p4895_p10 = scmp.ne.s32.totalorder %s5204_s2, %s4894_s10  ;;  %p4898_p11 = scmp.lt.u32.totalorder %s4894_s10, %s5204_s2 }
  0x39   :  { %p4900_p12 = pnand %p4898_p11, %p4895_p10 }
  0x3b   :  { %4903 = shalt.err (!%p4900_p12)
}
  0x3c   :  { %s4904_s15 = scalar_lea.vmem %s43_s23, 112  ;;  %s4908_s16 = scalar_lea.vmem %s43_s23, 128 }
  0x3d   :  { %p4905_p13 = scmp.ne.s32.totalorder %s43_s23, %s4904_s15  ;;  %p4909_p0 = scmp.lt.s32.totalorder %s43_s23, %s43_s23 }
  0x3e   :  { %p4910_p1 = scmp.lt.s32.totalorder %s4908_s16, %s4904_s15 }
  0x40   :  { %p4911_p2 = por %p4910_p1, %p4909_p0 }
  0x42   :  { %p4912_p3 = pnand %p4911_p2, %p4905_p13 }
  0x44   :  { %4915 = shalt.err (!%p4912_p3)
}
  0x45   :  { %45 = dma.hbm_to_vmem [thread:$0]  %s5204_s2, 112, %s43_s23, [#allocation6]  }
  0x46   :  { %s4976_s17 = smov [#allocation10]   ;;  %s4916_s21 = scalar_lea.hbm %s5206_s4, 16 }
  0x47   :  { %s64_s18 = sshll.u32 %s4976_s17, 4  ;;  %p4917_p4 = scmp.ne.s32.totalorder %s5206_s4, %s4916_s21  ;;  %s65_s18 = int_to_ptr.vmem [resolvable:$true] %s64_s18 }
  0x48   :  { %p4920_p5 = scmp.lt.u32.totalorder %s4916_s21, %s5206_s4 }
  0x4a   :  { %p4922_p6 = pnand %p4920_p5, %p4917_p4 }
  0x4c   :  { %4925 = shalt.err (!%p4922_p6)
}
  0x4d   :  { %s4926_s27 = scalar_lea.vmem %s65_s18, 16  ;;  %s4930_s2 = scalar_lea.vmem %s65_s18, 32 }
  0x4e   :  { %p4927_p7 = scmp.ne.s32.totalorder %s65_s18, %s4926_s27  ;;  %p4931_p8 = scmp.lt.s32.totalorder %s65_s18, %s65_s18 }
  0x4f   :  { %p4932_p9 = scmp.lt.s32.totalorder %s4930_s2, %s4926_s27 }
  0x51   :  { %p4933_p10 = por %p4932_p9, %p4931_p8 }
  0x53   :  { %p4934_p11 = pnand %p4933_p10, %p4927_p7 }
  0x55   :  { %4937 = shalt.err (!%p4934_p11)
}
  0x56   :  { %67 = dma.hbm_to_vmem [thread:$0]  %s5206_s4, 16, %s65_s18, [#allocation9]  }
  0x57   :  { %4960 = dma.done.wait [#allocation3], 224  }
  0x58   :  { %4961 = vsyncadd [#allocation3], 4294967072 }
  0x59   :  { %4962 = dma.done.wait [#allocation6], 44016  }
  0x5a   :  { %4963 = vsyncadd [#allocation6], 4294923280 }
  0x5b   :  { %4964 = dma.done.wait [#allocation9], 7184  }
  0x5c   :  { %4965 = vsyncadd [#allocation9], 4294960112  ;;  %v4977_v0 = vmov 0   ;;  %v4978_v1 = vmov 1983009808   ;;  %v92_v3 = vlaneseq  ;;  %vm2328_vm0 = vcmask 130048  }
  0x5d   :  { %2487 = vmatprep.mubr.bf16.mxu1 %v4977_v0  ;;  %v90_v2 = vunpack.c.l.s4 %v4978_v1  ;;  %v4276_v4 = vld [vmem:[#allocation5 + $0x4] ss:$28 sps:$4 sm:$0xff]   ;;  %v4282_v10 = vld [vmem:[#allocation5 + $0x3c] ss:$28 sps:$4 sm:$0xff]   ;;  %v4286_v11 = vld [vmem:[#allocation5 + $0xc] ss:$28 sps:$4 sm:$0xff]  }
  0x5e   :  { %v5074_v6 = vshrl.u32 %v92_v3, 7  ;;  %v4278_v7 = vld [vmem:[#allocation5 + $0xa84] ss:$28 sps:$4 sm:$0xff]   ;;  %2332 = vmatprep.subr.bf16.mxu0 %v4276_v4  ;;  %v4287_v13 = vld [vmem:[#allocation5 + $0x38] ss:$28 sps:$4 sm:$0xff]   ;;  %vm4980_vm1 = vmmov 0  }
  0x5f   :  { %v91_v5 = vunpack.c.0.s8 %v90_v2  ;;  %v4280_v8 = vld [vmem:[#allocation5] ss:$28 sps:$4 sm:$0xff]   ;;  %2455 = vmatprep.subr.bf16.mxu1 %v4278_v7  ;;  %v4289_v16 = vld [vmem:[#allocation5 + $0x74] ss:$28 sps:$4 sm:$0xff]   ;;  %v4284_v17 = vld [vmem:[#allocation5 + $0x8] ss:$28 sps:$4 sm:$0xff]  }
  0x60   :  { %v4281_v9 = vld [vmem:[#allocation5 + $0xa80] ss:$28 sps:$4 sm:$0xff]   ;;  %2333 = vmatpush1.bf16.msra.mxu0 %v4280_v8  ;;  %v4294_v19 = vld [vmem:[#allocation5 + $0x70] ss:$28 sps:$4 sm:$0xff]   ;;  %v4300_v23 = vld [vmem:[#allocation5 + $0xa8] ss:$28 sps:$4 sm:$0xff]  }
  0x61   :  { %2456 = vmatpush1.bf16.msra.mxu1 %v4281_v9  ;;  %v5077_v12 = vsub.s32 %v91_v5, %v5074_v6  ;;  %2334 = vmatprep.subr.bf16.mxu0 %v4282_v10  ;;  %v5079_v14 = vld [vmem:[#allocation2 + $0x8] sm:$0x3f]  ;;  %v4295_v20 = vld [vmem:[#allocation5 + $0xac] ss:$28 sps:$4 sm:$0xff]   ;;  %v4293_v22 = vld [vmem:[#allocation5 + $0x44] ss:$28 sps:$4 sm:$0xff]  }
  0x62   :  { %2496 = vmatprep.subr.bf16.mxu1 %v4286_v11  ;;  %v105_v15 = vcombine.high %v5079_v14, %v5079_v14  ;;  %v4291_v24 = vld [vmem:[#allocation5 + $0x40] ss:$28 sps:$4 sm:$0xff]   ;;  %v4297_v27 = vld [vmem:[#allocation5 + $0x78] ss:$28 sps:$4 sm:$0xff]   ;;  %v4303_v32 = vld [vmem:[#allocation5 + $0xb0] ss:$28 sps:$4 sm:$0xff]  }
  0x63   :  { %v4301_v25 = vld [vmem:[#allocation5 + $0xe4] ss:$28 sps:$4 sm:$0xff]   ;;  %v4299_v26 = vld [vmem:[#allocation5 + $0x7c] ss:$28 sps:$4 sm:$0xff]   ;;  %v4305_v30 = vld [vmem:[#allocation5 + $0xb4] ss:$28 sps:$4 sm:$0xff]  }
  0x64   :  { %2335 = vmatpush1.bf16.msra.mxu0 %v4287_v13  ;;  %v119_v18 = vrot.slane %v105_v15, %v5077_v12  ;;  %v4306_v28 = vld [vmem:[#allocation5 + $0xe0] ss:$28 sps:$4 sm:$0xff]   ;;  %v4312_v31 = vld [vmem:[#allocation5 + $0x118] ss:$28 sps:$4 sm:$0xff]   ;;  %v4311_v34 = vld [vmem:[#allocation5 + $0xec] ss:$28 sps:$4 sm:$0xff]  }
  0x65   :  { %2336 = vmatprep.subr.bf16.mxu0 %v4289_v16  ;;  %v4307_v29 = vld [vmem:[#allocation5 + $0x11c] ss:$28 sps:$4 sm:$0xff]   ;;  %v4313_v33 = vld [vmem:[#allocation5 + $0x154] ss:$28 sps:$4 sm:$0xff]   ;;  %v4309_v35 = vld [vmem:[#allocation5 + $0xe8] ss:$28 sps:$4 sm:$0xff]  }
  0x66   :  { %v5084_v21 = vpack.c.bf16 %v119_v18, %v119_v18  ;;  %v4318_v36 = vld [vmem:[#allocation5 + $0x150] ss:$28 sps:$4 sm:$0xff]   ;;  %v4317_v38 = vld [vmem:[#allocation5 + $0x124] ss:$28 sps:$4 sm:$0xff]   ;;  %v4323_v42 = vld [vmem:[#allocation5 + $0x15c] ss:$28 sps:$4 sm:$0xff]  }
  0x67   :  { %v4319_v37 = vld [vmem:[#allocation5 + $0x18c] ss:$28 sps:$4 sm:$0xff]   ;;  %v4315_v40 = vld [vmem:[#allocation5 + $0x120] ss:$28 sps:$4 sm:$0xff]   ;;  %v4321_v43 = vld [vmem:[#allocation5 + $0x158] ss:$28 sps:$4 sm:$0xff]  }
  0x68   :  { %3994 = vmatmul.mubr.msk.bf16.vlgmr.msra.gmra.mrb[0].mxu1 %vm2328_vm0, %v5084_v21  ;;  %2337 = vmatpush1.bf16.msra.mxu0 %v4294_v19  ;;  %v4324_v39 = vld [vmem:[#allocation5 + $0x188] ss:$28 sps:$4 sm:$0xff]   ;;  %v4330_v44 = vld [vmem:[#allocation5 + $0x1c0] ss:$28 sps:$4 sm:$0xff]   ;;  %v4329_v46 = vld [vmem:[#allocation5 + $0x194] ss:$28 sps:$4 sm:$0xff]  }
  0x69   :  { %2497 = vmatpush1.bf16.msra.mxu1 %v4284_v17  ;;  %2338 = vmatprep.subr.bf16.mxu0 %v4295_v20  ;;  %v4325_v41 = vld [vmem:[#allocation5 + $0x1c4] ss:$28 sps:$4 sm:$0xff]   ;;  %v4331_v45 = vld [vmem:[#allocation5 + $0x1fc] ss:$28 sps:$4 sm:$0xff]   ;;  %v4327_v48 = vld [vmem:[#allocation5 + $0x190] ss:$28 sps:$4 sm:$0xff]  }
  0x6a   :  { %2498 = vmatprep.subr.bf16.mxu1 %v4293_v22  ;;  %v4336_v47 = vld [vmem:[#allocation5 + $0x1f8] ss:$28 sps:$4 sm:$0xff]   ;;  %v4335_v50 = vld [vmem:[#allocation5 + $0x1cc] ss:$28 sps:$4 sm:$0xff]   ;;  %v4341_v54 = vld [vmem:[#allocation5 + $0x204] ss:$28 sps:$4 sm:$0xff]  }
  0x6b   :  { %v4337_v49 = vld [vmem:[#allocation5 + $0x234] ss:$28 sps:$4 sm:$0xff]   ;;  %v4333_v51 = vld [vmem:[#allocation5 + $0x1c8] ss:$28 sps:$4 sm:$0xff]   ;;  %v4339_v58 = vld [vmem:[#allocation5 + $0x200] ss:$28 sps:$4 sm:$0xff]  }
  0x6c   :  { %2339 = vmatpush1.bf16.msra.mxu0 %v4300_v23  ;;  %v4342_v52 = vld [vmem:[#allocation5 + $0x230] ss:$28 sps:$4 sm:$0xff]   ;;  %v4348_v56 = vld [vmem:[#allocation5 + $0x268] ss:$28 sps:$4 sm:$0xff]   ;;  %v4347_v60 = vld [vmem:[#allocation5 + $0x23c] ss:$28 sps:$4 sm:$0xff]  }
  0x6d   :  { %2499 = vmatpush1.bf16.msra.mxu1 %v4291_v24  ;;  %2340 = vmatprep.subr.bf16.mxu0 %v4301_v25  ;;  %v4343_v53 = vld [vmem:[#allocation5 + $0x26c] ss:$28 sps:$4 sm:$0xff]   ;;  %v84_v55 = vld [vmem:[#allocation2] sm:$0xff]  ;;  %v4349_v59 = vld [vmem:[#allocation5 + $0x2a4] ss:$28 sps:$4 sm:$0xff]   ;;  %vm3618_vm3 = vcmask 1041408  }
  0x6e   :  { %2500 = vmatprep.subr.bf16.mxu1 %v4299_v26  ;;  %v95_v57 = vrot.slane %v84_v55, %v5077_v12  ;;  %v4354_v62 = vld [vmem:[#allocation5 + $0x2a0] ss:$28 sps:$4 sm:$0xff]   ;;  %v4345_v1 = vld [vmem:[#allocation5 + $0x238] ss:$28 sps:$4 sm:$0xff]   ;;  %v88_v7 = vcombine.high %v84_v55, %v84_v55  ;;  %v4351_v8 = vld [vmem:[#allocation5 + $0x270] ss:$28 sps:$4 sm:$0xff]  }
  0x6f   :  { %v4355_v2 = vld [vmem:[#allocation5 + $0x2dc] ss:$28 sps:$4 sm:$0xff]   ;;  %v4353_v4 = vld [vmem:[#allocation5 + $0x274] ss:$28 sps:$4 sm:$0xff]   ;;  %v4359_v10 = vld [vmem:[#allocation5 + $0x2ac] ss:$28 sps:$4 sm:$0xff]  }
  0x70   :  { %2341 = vmatpush1.bf16.msra.mxu0 %v4306_v28  ;;  %v103_v61 = vcombine.high %v95_v57, %v95_v57  ;;  %v4360_v5 = vld [vmem:[#allocation5 + $0x2d8] ss:$28 sps:$4 sm:$0xff]   ;;  %v4366_v11 = vld [vmem:[#allocation5 + $0x310] ss:$28 sps:$4 sm:$0xff]   ;;  %v5094_v13 = vrot.slane %v88_v7, %v5077_v12  ;;  %v4357_v15 = vld [vmem:[#allocation5 + $0x2a8] ss:$28 sps:$4 sm:$0xff]   ;;  %v5098_v24 = vpack.c.bf16 %v95_v57, %v95_v57 }
  0x71   :  { %2501 = vmatpush1.bf16.msra.mxu1 %v4297_v27  ;;  %2342 = vmatprep.subr.bf16.mxu0 %v4307_v29  ;;  %v4361_v9 = vld [vmem:[#allocation5 + $0x314] ss:$28 sps:$4 sm:$0xff]   ;;  %v4367_v16 = vld [vmem:[#allocation5 + $0x34c] ss:$28 sps:$4 sm:$0xff]   ;;  %v4365_v17 = vld [vmem:[#allocation5 + $0x2e4] ss:$28 sps:$4 sm:$0xff]   ;;  %v5104_v29 = vrot.slane %v5079_v14, %v5077_v12 }
  0x72   :  { %2502 = vmatprep.subr.bf16.mxu1 %v4305_v30  ;;  %v5089_v63 = vpack.c.bf16 %v103_v61, %v103_v61  ;;  %v4372_v18 = vld [vmem:[#allocation5 + $0x348] ss:$28 sps:$4 sm:$0xff]   ;;  %v104_v19 = vcombine.high %v5094_v13, %v5094_v13  ;;  %v4363_v20 = vld [vmem:[#allocation5 + $0x2e0] ss:$28 sps:$4 sm:$0xff]   ;;  %v4369_v27 = vld [vmem:[#allocation5 + $0x318] ss:$28 sps:$4 sm:$0xff]  }
  0x73   :  { %v4375_v22 = vld [vmem:[#allocation5 + $0x384] ss:$28 sps:$4 sm:$0xff]   ;;  %v4371_v23 = vld [vmem:[#allocation5 + $0x31c] ss:$28 sps:$4 sm:$0xff]   ;;  %v4378_v30 = vld [vmem:[#allocation5 + $0x354] ss:$28 sps:$4 sm:$0xff]  }
  0x74   :  { %2343 = vmatpush1.bf16.msra.mxu0 %v4312_v31  ;;  %2364 = vmatprep.mubr.bf16.mxu0 %v5089_v63  ;;  %v4373_v25 = vld [vmem:[#allocation5 + $0x380] ss:$28 sps:$4 sm:$0xff]   ;;  %v5100_v26 = vpack.c.bf16 %v104_v19, %v104_v19  ;;  %v4379_v31 = vld [vmem:[#allocation5 + $0x3b8] ss:$28 sps:$4 sm:$0xff]   ;;  %v4393_v12 = vld [vmem:[#allocation5 + $0x42c] ss:$28 sps:$4 sm:$0xff]  }
  0x75   :  { %2503 = vmatpush1.bf16.msra.mxu1 %v4303_v32  ;;  %2344 = vmatprep.subr.bf16.mxu0 %v4313_v33  ;;  %v4381_v28 = vld [vmem:[#allocation5 + $0x3bc] ss:$28 sps:$4 sm:$0xff]   ;;  %v4376_v32 = vld [vmem:[#allocation5 + $0x350] ss:$28 sps:$4 sm:$0xff]   ;;  %v4390_v14 = vld [vmem:[#allocation5 + $0x3c4] ss:$28 sps:$4 sm:$0xff]  }
  0x76   :  { %2504 = vmatprep.subr.bf16.mxu1 %v4311_v34  ;;  %2528 = vmatprep.mubr.bf16.mxu1 %v5089_v63  ;;  %v4387_v33 = vld [vmem:[#allocation5 + $0x3f4] ss:$28 sps:$4 sm:$0xff]   ;;  %v4384_v34 = vld [vmem:[#allocation5 + $0x38c] ss:$28 sps:$4 sm:$0xff]   ;;  %v4423_v55 = vld [vmem:[#allocation5 + $0x544] ss:$28 sps:$4 sm:$0xff]  }
  0x77   :  { %v4421_v57 = vld [vmem:[#allocation5 + $0x540] ss:$28 sps:$4 sm:$0xff]   ;;  %v4427_v61 = vld [vmem:[#allocation5 + $0x578] ss:$28 sps:$4 sm:$0xff]   ;;  %v4441_v7 = vld [vmem:[#allocation5 + $0x5ec] ss:$28 sps:$4 sm:$0xff]  }
  0x78   :  { %2345 = vmatpush1.bf16.msra.mxu0 %v4318_v36  ;;  %v4382_v36 = vld [vmem:[#allocation5 + $0x388] ss:$28 sps:$4 sm:$0xff]   ;;  %v4450_v19 = vld [vmem:[#allocation5 + $0x5f4] ss:$28 sps:$4 sm:$0xff]   ;;  %s4981_s4 = smov [#allocation11]  }
  0x79   :  { %2505 = vmatpush1.bf16.msra.mxu1 %v4309_v35  ;;  %2346 = vmatprep.subr.bf16.mxu0 %v4319_v37  ;;  %v4385_v35 = vld [vmem:[#allocation5 + $0x3f0] ss:$28 sps:$4 sm:$0xff]   ;;  %v4391_v37 = vld [vmem:[#allocation5 + $0x428] ss:$28 sps:$4 sm:$0xff]   ;;  %s3640_s29 = sshll.u32 %s4981_s4, 4  ;;  %s3641_s29 = int_to_ptr.vmem [resolvable:$true] %s3640_s29 }
  0x7a   :  { %2506 = vmatprep.subr.bf16.mxu1 %v4317_v38  ;;  %v4388_v38 = vld [vmem:[#allocation5 + $0x3c0] ss:$28 sps:$4 sm:$0xff]   ;;  %s4938_s30 = scalar_lea.vmem %s3641_s29, 32  ;;  %p4943_p13 = scmp.lt.s32.totalorder %s3641_s29, %s3641_s29 }
  0x7b   :  { %p4939_p12 = scmp.ne.s32.totalorder %s3641_s29, %s4938_s30  ;;  %p4944_p0 = scmp.lt.s32.totalorder %s4938_s30, %s4938_s30 }
  0x7c   :  { %2347 = vmatpush1.bf16.msra.mxu0 %v4324_v39  ;;  %v4399_v39 = vld [vmem:[#allocation5 + $0x464] ss:$28 sps:$4 sm:$0xff]  }
  0x7d   :  { %2507 = vmatpush1.bf16.msra.mxu1 %v4315_v40  ;;  %2348 = vmatprep.subr.bf16.mxu0 %v4325_v41  ;;  %v4396_v40 = vld [vmem:[#allocation5 + $0x3fc] ss:$28 sps:$4 sm:$0xff]   ;;  %p4945_p1 = por %p4944_p0, %p4943_p13 }
  0x7e   :  { %2508 = vmatprep.subr.bf16.mxu1 %v4323_v42  ;;  %v4397_v41 = vld [vmem:[#allocation5 + $0x460] ss:$28 sps:$4 sm:$0xff]   ;;  %v4394_v42 = vld [vmem:[#allocation5 + $0x3f8] ss:$28 sps:$4 sm:$0xff]  }
  0x7f   :  { %p4946_p2 = pnand %p4945_p1, %p4939_p12 }
  0x80   :  { %2349 = vmatpush1.bf16.msra.mxu0 %v4330_v44  ;;  %v4402_v44 = vld [vmem:[#allocation5 + $0x434] ss:$28 sps:$4 sm:$0xff]  }
  0x81   :  { %2509 = vmatpush1.bf16.msra.mxu1 %v4321_v43  ;;  %2350 = vmatprep.subr.bf16.mxu0 %v4331_v45  ;;  %v4405_v43 = vld [vmem:[#allocation5 + $0x49c] ss:$28 sps:$4 sm:$0xff]  }
  0x82   :  { %2510 = vmatprep.subr.bf16.mxu1 %v4329_v46  ;;  %v4403_v45 = vld [vmem:[#allocation5 + $0x498] ss:$28 sps:$4 sm:$0xff]   ;;  %v4400_v46 = vld [vmem:[#allocation5 + $0x430] ss:$28 sps:$4 sm:$0xff]  }
  0x84   :  { %2351 = vmatpush1.bf16.msra.mxu0 %v4336_v47  ;;  %v4411_v47 = vld [vmem:[#allocation5 + $0x4d4] ss:$28 sps:$4 sm:$0xff]  }
  0x85   :  { %2511 = vmatpush1.bf16.msra.mxu1 %v4327_v48  ;;  %2352 = vmatprep.subr.bf16.mxu0 %v4337_v49  ;;  %v4408_v48 = vld [vmem:[#allocation5 + $0x46c] ss:$28 sps:$4 sm:$0xff]  }
  0x86   :  { %2512 = vmatprep.subr.bf16.mxu1 %v4335_v50  ;;  %v4409_v49 = vld [vmem:[#allocation5 + $0x4d0] ss:$28 sps:$4 sm:$0xff]   ;;  %v4406_v50 = vld [vmem:[#allocation5 + $0x468] ss:$28 sps:$4 sm:$0xff]  }
  0x88   :  { %2353 = vmatpush1.bf16.msra.mxu0 %v4342_v52  ;;  %v4414_v52 = vld [vmem:[#allocation5 + $0x4a4] ss:$28 sps:$4 sm:$0xff]  }
  0x89   :  { %2513 = vmatpush1.bf16.msra.mxu1 %v4333_v51  ;;  %2354 = vmatprep.subr.bf16.mxu0 %v4343_v53  ;;  %v4417_v51 = vld [vmem:[#allocation5 + $0x50c] ss:$28 sps:$4 sm:$0xff]  }
  0x8a   :  { %2514 = vmatprep.subr.bf16.mxu1 %v4341_v54  ;;  %v4415_v53 = vld [vmem:[#allocation5 + $0x508] ss:$28 sps:$4 sm:$0xff]   ;;  %v4412_v54 = vld [vmem:[#allocation5 + $0x4a0] ss:$28 sps:$4 sm:$0xff]  }
  0x8c   :  { %2355 = vmatpush1.bf16.msra.mxu0 %v4348_v56  ;;  %v4420_v56 = vld [vmem:[#allocation5 + $0x4dc] ss:$28 sps:$4 sm:$0xff]  }
  0x8d   :  { %2515 = vmatpush1.bf16.msra.mxu1 %v4339_v58  ;;  %2356 = vmatprep.subr.bf16.mxu0 %v4349_v59  ;;  %v4418_v58 = vld [vmem:[#allocation5 + $0x4d8] ss:$28 sps:$4 sm:$0xff]  }
  0x8e   :  { %2516 = vmatprep.subr.bf16.mxu1 %v4347_v60  ;;  %v4429_v59 = vld [vmem:[#allocation5 + $0x57c] ss:$28 sps:$4 sm:$0xff]   ;;  %v4426_v60 = vld [vmem:[#allocation5 + $0x514] ss:$28 sps:$4 sm:$0xff]  }
  0x90   :  { %2357 = vmatpush1.bf16.msra.mxu0 %v4354_v62  ;;  %v4424_v62 = vld [vmem:[#allocation5 + $0x510] ss:$28 sps:$4 sm:$0xff]  }
  0x91   :  { %2517 = vmatpush1.bf16.msra.mxu1 %v4345_v1  ;;  %2358 = vmatprep.subr.bf16.mxu0 %v4355_v2  ;;  %v4435_v1 = vld [vmem:[#allocation5 + $0x5b4] ss:$28 sps:$4 sm:$0xff]   ;;  %v4432_v2 = vld [vmem:[#allocation5 + $0x54c] ss:$28 sps:$4 sm:$0xff]  }
  0x92   :  { %2518 = vmatprep.subr.bf16.mxu1 %v4353_v4  ;;  %v4433_v4 = vld [vmem:[#allocation5 + $0x5b0] ss:$28 sps:$4 sm:$0xff]  }
  0x94   :  { %2359 = vmatpush1.bf16.msra.mxu0 %v4360_v5  ;;  %v4430_v5 = vld [vmem:[#allocation5 + $0x548] ss:$28 sps:$4 sm:$0xff]  }
  0x95   :  { %2519 = vmatpush1.bf16.msra.mxu1 %v4351_v8  ;;  %2360 = vmatprep.subr.bf16.mxu0 %v4361_v9  ;;  %v4438_v8 = vld [vmem:[#allocation5 + $0x584] ss:$28 sps:$4 sm:$0xff]  }
  0x96   :  { %2520 = vmatprep.subr.bf16.mxu1 %v4359_v10  ;;  %v4439_v9 = vld [vmem:[#allocation5 + $0x5e8] ss:$28 sps:$4 sm:$0xff]   ;;  %v4436_v10 = vld [vmem:[#allocation5 + $0x580] ss:$28 sps:$4 sm:$0xff]  }
  0x98   :  { %2361 = vmatpush1.bf16.msra.mxu0 %v4366_v11  ;;  %v4447_v11 = vld [vmem:[#allocation5 + $0x624] ss:$28 sps:$4 sm:$0xff]  }
  0x99   :  { %2521 = vmatpush1.bf16.msra.mxu1 %v4357_v15  ;;  %2362 = vmatprep.subr.bf16.mxu0 %v4367_v16  ;;  %v4444_v15 = vld [vmem:[#allocation5 + $0x5bc] ss:$28 sps:$4 sm:$0xff]  }
  0x9a   :  { %2522 = vmatprep.subr.bf16.mxu1 %v4365_v17  ;;  %v4445_v16 = vld [vmem:[#allocation5 + $0x620] ss:$28 sps:$4 sm:$0xff]   ;;  %v4442_v17 = vld [vmem:[#allocation5 + $0x5b8] ss:$28 sps:$4 sm:$0xff]  }
  0x9c   :  { %2363 = vmatpush1.bf16.msra.mxu0 %v4372_v18  ;;  %v4453_v18 = vld [vmem:[#allocation5 + $0x65c] ss:$28 sps:$4 sm:$0xff]  }
  0x9d   :  { %2523 = vmatpush1.bf16.msra.mxu1 %v4363_v20  ;;  %2373 = vmatprep.subr.bf16.mxu0 %v4375_v22  ;;  %v4451_v20 = vld [vmem:[#allocation5 + $0x658] ss:$28 sps:$4 sm:$0xff]   ;;  %v4448_v22 = vld [vmem:[#allocation5 + $0x5f0] ss:$28 sps:$4 sm:$0xff]  }
  0x9e   :  { %2524 = vmatprep.subr.bf16.mxu1 %v4371_v23  ;;  %v4459_v23 = vld [vmem:[#allocation5 + $0x694] ss:$28 sps:$4 sm:$0xff]  }
  0x9f   :  { %2365 = vmatmul.mubr.bf16.vlgmr.msra.gmra.mrb[0].mxu0 %v5098_v24 }
  0xa0   :  { %2374 = vmatpush1.bf16.msra.mxu0 %v4373_v25  ;;  %2405 = vmatprep.mubr.bf16.mxu0 %v5100_v26  ;;  %v4456_v25 = vld [vmem:[#allocation5 + $0x62c] ss:$28 sps:$4 sm:$0xff]  }
  0xa1   :  { %2525 = vmatpush1.bf16.msra.mxu1 %v4369_v27  ;;  %2375 = vmatprep.subr.bf16.mxu0 %v4381_v28  ;;  %v4457_v27 = vld [vmem:[#allocation5 + $0x690] ss:$28 sps:$4 sm:$0xff]   ;;  %v4454_v28 = vld [vmem:[#allocation5 + $0x628] ss:$28 sps:$4 sm:$0xff]  }
  0xa2   :  { %2526 = vmatprep.subr.bf16.mxu1 %v4378_v30  ;;  %v4465_v30 = vld [vmem:[#allocation5 + $0x6cc] ss:$28 sps:$4 sm:$0xff]  }
  0xa4   :  { %2376 = vmatpush1.bf16.msra.mxu0 %v4379_v31  ;;  %v4462_v31 = vld [vmem:[#allocation5 + $0x664] ss:$28 sps:$4 sm:$0xff]  }
  0xa5   :  { %2527 = vmatpush1.bf16.msra.mxu1 %v4376_v32  ;;  %2377 = vmatprep.subr.bf16.mxu0 %v4387_v33  ;;  %v4463_v32 = vld [vmem:[#allocation5 + $0x6c8] ss:$28 sps:$4 sm:$0xff]   ;;  %v120_v33 = vcombine.high %v5104_v29, %v5104_v29 }
  0xa6   :  { %2537 = vmatprep.subr.bf16.mxu1 %v4384_v34  ;;  %v4460_v34 = vld [vmem:[#allocation5 + $0x660] ss:$28 sps:$4 sm:$0xff]  }
  0xa8   :  { %2529 = vmatmul.mubr.bf16.vlgmr.msra.gmra.mrb[4].mxu1 %v5098_v24  ;;  %2378 = vmatpush1.bf16.msra.mxu0 %v4385_v35  ;;  %v4472_v35 = vld [vmem:[#allocation5 + $0x704] ss:$28 sps:$4 sm:$0xff]  }
  0xa9   :  { %2538 = vmatpush1.bf16.msra.mxu1 %v4382_v36  ;;  %2379 = vmatprep.subr.bf16.mxu0 %v4393_v12  ;;  %v4468_v36 = vld [vmem:[#allocation5 + $0x69c] ss:$28 sps:$4 sm:$0xff]   ;;  %v5114_v12 = vpack.c.bf16 %v5094_v13, %v5094_v13  ;;  %v4484_v13 = vld [vmem:[#allocation5 + $0x774] ss:$28 sps:$4 sm:$0xff]  }
  0xaa   :  { %2539 = vmatprep.subr.bf16.mxu1 %v4390_v14  ;;  %2569 = vmatprep.mubr.bf16.mxu1 %v5100_v26  ;;  %v4470_v14 = vld [vmem:[#allocation5 + $0x700] ss:$28 sps:$4 sm:$0xff]  }
  0xac   :  { %2380 = vmatpush1.bf16.msra.mxu0 %v4391_v37  ;;  %v5116_v37 = vpack.c.bf16 %v120_v33, %v120_v33  ;;  %v4550_v33 = vld [vmem:[#allocation5 + $0x9dc] ss:$28 sps:$4 sm:$0xff]  }
  0xad   :  { %2540 = vmatpush1.bf16.msra.mxu1 %v4388_v38  ;;  %2381 = vmatprep.subr.bf16.mxu0 %v4399_v39  ;;  %v4466_v38 = vld [vmem:[#allocation5 + $0x698] ss:$28 sps:$4 sm:$0xff]  }
  0xae   :  { %2541 = vmatprep.subr.bf16.mxu1 %v4396_v40  ;;  %v4478_v39 = vld [vmem:[#allocation5 + $0x73c] ss:$28 sps:$4 sm:$0xff]   ;;  %v4475_v40 = vld [vmem:[#allocation5 + $0x6d4] ss:$28 sps:$4 sm:$0xff]  }
  0xb0   :  { %2382 = vmatpush1.bf16.msra.mxu0 %v4397_v41  ;;  %v4476_v41 = vld [vmem:[#allocation5 + $0x738] ss:$28 sps:$4 sm:$0xff]  }
  0xb1   :  { %2542 = vmatpush1.bf16.msra.mxu1 %v4394_v42  ;;  %2383 = vmatprep.subr.bf16.mxu0 %v4405_v43  ;;  %v4473_v42 = vld [vmem:[#allocation5 + $0x6d0] ss:$28 sps:$4 sm:$0xff]  }
  0xb2   :  { %2543 = vmatprep.subr.bf16.mxu1 %v4402_v44  ;;  %v4481_v43 = vld [vmem:[#allocation5 + $0x70c] ss:$28 sps:$4 sm:$0xff]  }
  0xb3   :  { %v4482_v44 = vld [vmem:[#allocation5 + $0x770] ss:$28 sps:$4 sm:$0xff]  }
  0xb4   :  { %2384 = vmatpush1.bf16.msra.mxu0 %v4403_v45  ;;  %v4479_v45 = vld [vmem:[#allocation5 + $0x708] ss:$28 sps:$4 sm:$0xff]  }
  0xb5   :  { %2544 = vmatpush1.bf16.msra.mxu1 %v4400_v46  ;;  %2385 = vmatprep.subr.bf16.mxu0 %v4411_v47  ;;  %v4490_v46 = vld [vmem:[#allocation5 + $0x7ac] ss:$28 sps:$4 sm:$0xff]   ;;  %v4487_v47 = vld [vmem:[#allocation5 + $0x744] ss:$28 sps:$4 sm:$0xff]  }
  0xb6   :  { %2545 = vmatprep.subr.bf16.mxu1 %v4408_v48  ;;  %v4488_v48 = vld [vmem:[#allocation5 + $0x7a8] ss:$28 sps:$4 sm:$0xff]  }
  0xb8   :  { %2386 = vmatpush1.bf16.msra.mxu0 %v4409_v49  ;;  %v4485_v49 = vld [vmem:[#allocation5 + $0x740] ss:$28 sps:$4 sm:$0xff]  }
  0xb9   :  { %2546 = vmatpush1.bf16.msra.mxu1 %v4406_v50  ;;  %2387 = vmatprep.subr.bf16.mxu0 %v4417_v51  ;;  %v4496_v50 = vld [vmem:[#allocation5 + $0x7e4] ss:$28 sps:$4 sm:$0xff]   ;;  %v4493_v51 = vld [vmem:[#allocation5 + $0x77c] ss:$28 sps:$4 sm:$0xff]  }
  0xba   :  { %2547 = vmatprep.subr.bf16.mxu1 %v4414_v52  ;;  %v4491_v52 = vld [vmem:[#allocation5 + $0x778] ss:$28 sps:$4 sm:$0xff]  }
  0xbc   :  { %2388 = vmatpush1.bf16.msra.mxu0 %v4415_v53  ;;  %v4494_v53 = vld [vmem:[#allocation5 + $0x7e0] ss:$28 sps:$4 sm:$0xff]  }
  0xbd   :  { %2548 = vmatpush1.bf16.msra.mxu1 %v4412_v54  ;;  %2389 = vmatprep.subr.bf16.mxu0 %v4423_v55  ;;  %v4502_v54 = vld [vmem:[#allocation5 + $0x81c] ss:$28 sps:$4 sm:$0xff]   ;;  %v4499_v55 = vld [vmem:[#allocation5 + $0x7b4] ss:$28 sps:$4 sm:$0xff]  }
  0xbe   :  { %2549 = vmatprep.subr.bf16.mxu1 %v4420_v56  ;;  %v4500_v56 = vld [vmem:[#allocation5 + $0x818] ss:$28 sps:$4 sm:$0xff]  }
  0xc0   :  { %2390 = vmatpush1.bf16.msra.mxu0 %v4421_v57  ;;  %v4497_v57 = vld [vmem:[#allocation5 + $0x7b0] ss:$28 sps:$4 sm:$0xff]  }
  0xc1   :  { %2550 = vmatpush1.bf16.msra.mxu1 %v4418_v58  ;;  %2391 = vmatprep.subr.bf16.mxu0 %v4429_v59  ;;  %v4508_v58 = vld [vmem:[#allocation5 + $0x854] ss:$28 sps:$4 sm:$0xff]   ;;  %v4505_v59 = vld [vmem:[#allocation5 + $0x7ec] ss:$28 sps:$4 sm:$0xff]  }
  0xc2   :  { %2551 = vmatprep.subr.bf16.mxu1 %v4426_v60  ;;  %v4503_v60 = vld [vmem:[#allocation5 + $0x7e8] ss:$28 sps:$4 sm:$0xff]  }
  0xc4   :  { %2392 = vmatpush1.bf16.msra.mxu0 %v4427_v61  ;;  %v4506_v61 = vld [vmem:[#allocation5 + $0x850] ss:$28 sps:$4 sm:$0xff]  }
  0xc5   :  { %2552 = vmatpush1.bf16.msra.mxu1 %v4424_v62  ;;  %2393 = vmatprep.subr.bf16.mxu0 %v4435_v1  ;;  %v4514_v62 = vld [vmem:[#allocation5 + $0x88c] ss:$28 sps:$4 sm:$0xff]   ;;  %v4511_v1 = vld [vmem:[#allocation5 + $0x824] ss:$28 sps:$4 sm:$0xff]  }
  0xc6   :  { %2553 = vmatprep.subr.bf16.mxu1 %v4432_v2  ;;  %v4509_v2 = vld [vmem:[#allocation5 + $0x820] ss:$28 sps:$4 sm:$0xff]  }
  0xc8   :  { %2394 = vmatpush1.bf16.msra.mxu0 %v4433_v4  ;;  %v4512_v4 = vld [vmem:[#allocation5 + $0x888] ss:$28 sps:$4 sm:$0xff]  }
  0xc9   :  { %2554 = vmatpush1.bf16.msra.mxu1 %v4430_v5  ;;  %2395 = vmatprep.subr.bf16.mxu0 %v4441_v7  ;;  %v4520_v5 = vld [vmem:[#allocation5 + $0x8c4] ss:$28 sps:$4 sm:$0xff]   ;;  %v4517_v7 = vld [vmem:[#allocation5 + $0x85c] ss:$28 sps:$4 sm:$0xff]  }
  0xca   :  { %2555 = vmatprep.subr.bf16.mxu1 %v4438_v8  ;;  %v4515_v8 = vld [vmem:[#allocation5 + $0x858] ss:$28 sps:$4 sm:$0xff]  }
  0xcc   :  { %2396 = vmatpush1.bf16.msra.mxu0 %v4439_v9  ;;  %v4518_v9 = vld [vmem:[#allocation5 + $0x8c0] ss:$28 sps:$4 sm:$0xff]  }
  0xcd   :  { %2556 = vmatpush1.bf16.msra.mxu1 %v4436_v10  ;;  %2397 = vmatprep.subr.bf16.mxu0 %v4447_v11  ;;  %v4526_v10 = vld [vmem:[#allocation5 + $0x8fc] ss:$28 sps:$4 sm:$0xff]   ;;  %v4523_v11 = vld [vmem:[#allocation5 + $0x894] ss:$28 sps:$4 sm:$0xff]  }
  0xce   :  { %2557 = vmatprep.subr.bf16.mxu1 %v4444_v15  ;;  %v4521_v15 = vld [vmem:[#allocation5 + $0x890] ss:$28 sps:$4 sm:$0xff]  }
  0xd0   :  { %2398 = vmatpush1.bf16.msra.mxu0 %v4445_v16  ;;  %v4524_v16 = vld [vmem:[#allocation5 + $0x8f8] ss:$28 sps:$4 sm:$0xff]  }
  0xd1   :  { %2558 = vmatpush1.bf16.msra.mxu1 %v4442_v17  ;;  %2399 = vmatprep.subr.bf16.mxu0 %v4453_v18  ;;  %v4532_v17 = vld [vmem:[#allocation5 + $0x934] ss:$28 sps:$4 sm:$0xff]   ;;  %v4529_v18 = vld [vmem:[#allocation5 + $0x8cc] ss:$28 sps:$4 sm:$0xff]  }
  0xd2   :  { %2559 = vmatprep.subr.bf16.mxu1 %v4450_v19  ;;  %v4530_v19 = vld [vmem:[#allocation5 + $0x930] ss:$28 sps:$4 sm:$0xff]  }
  0xd4   :  { %2400 = vmatpush1.bf16.msra.mxu0 %v4451_v20  ;;  %v4527_v20 = vld [vmem:[#allocation5 + $0x8c8] ss:$28 sps:$4 sm:$0xff]  }
  0xd5   :  { %2560 = vmatpush1.bf16.msra.mxu1 %v4448_v22  ;;  %2401 = vmatprep.subr.bf16.mxu0 %v4459_v23  ;;  %v4538_v22 = vld [vmem:[#allocation5 + $0x96c] ss:$28 sps:$4 sm:$0xff]   ;;  %v4535_v23 = vld [vmem:[#allocation5 + $0x904] ss:$28 sps:$4 sm:$0xff]  }
  0xd6   :  { %2561 = vmatprep.subr.bf16.mxu1 %v4456_v25  ;;  %v4533_v25 = vld [vmem:[#allocation5 + $0x900] ss:$28 sps:$4 sm:$0xff]  }
  0xd8   :  { %2402 = vmatpush1.bf16.msra.mxu0 %v4457_v27  ;;  %v4536_v27 = vld [vmem:[#allocation5 + $0x968] ss:$28 sps:$4 sm:$0xff]  }
  0xd9   :  { %2562 = vmatpush1.bf16.msra.mxu1 %v4454_v28  ;;  %2403 = vmatprep.subr.bf16.mxu0 %v4465_v30  ;;  %v4544_v28 = vld [vmem:[#allocation5 + $0x9a4] ss:$28 sps:$4 sm:$0xff]   ;;  %v4541_v30 = vld [vmem:[#allocation5 + $0x93c] ss:$28 sps:$4 sm:$0xff]  }
  0xda   :  { %2563 = vmatprep.subr.bf16.mxu1 %v4462_v31  ;;  %v4539_v31 = vld [vmem:[#allocation5 + $0x938] ss:$28 sps:$4 sm:$0xff]  }
  0xdc   :  { %2404 = vmatpush1.bf16.msra.mxu0 %v4463_v32  ;;  %v4542_v32 = vld [vmem:[#allocation5 + $0x9a0] ss:$28 sps:$4 sm:$0xff]  }
  0xdd   :  { %2564 = vmatpush1.bf16.msra.mxu1 %v4460_v34  ;;  %2414 = vmatprep.subr.bf16.mxu0 %v4472_v35  ;;  %v4547_v34 = vld [vmem:[#allocation5 + $0x974] ss:$28 sps:$4 sm:$0xff]  }
  0xde   :  { %2565 = vmatprep.subr.bf16.mxu1 %v4468_v36  ;;  %v4545_v35 = vld [vmem:[#allocation5 + $0x970] ss:$28 sps:$4 sm:$0xff]   ;;  %v4548_v36 = vld [vmem:[#allocation5 + $0x9d8] ss:$28 sps:$4 sm:$0xff]  }
  0xdf   :  { %2406 = vmatmul.mubr.bf16.vlgmr.msra.gmra.mrb[0].mxu0 %v5114_v12 }
  0xe0   :  { %2415 = vmatpush1.bf16.msra.mxu0 %v4470_v14  ;;  %2446 = vmatprep.mubr.bf16.mxu0 %v5116_v37  ;;  %v4556_v14 = vld [vmem:[#allocation5 + $0xa14] ss:$28 sps:$4 sm:$0xff]  }
  0xe1   :  { %2566 = vmatpush1.bf16.msra.mxu1 %v4466_v38  ;;  %2416 = vmatprep.subr.bf16.mxu0 %v4478_v39  ;;  %v4553_v38 = vld [vmem:[#allocation5 + $0x9ac] ss:$28 sps:$4 sm:$0xff]  }
  0xe2   :  { %2567 = vmatprep.subr.bf16.mxu1 %v4475_v40  ;;  %v4551_v39 = vld [vmem:[#allocation5 + $0x9a8] ss:$28 sps:$4 sm:$0xff]   ;;  %v4554_v40 = vld [vmem:[#allocation5 + $0xa10] ss:$28 sps:$4 sm:$0xff]  }
  0xe4   :  { %2417 = vmatpush1.bf16.msra.mxu0 %v4476_v41  ;;  %v4562_v41 = vld [vmem:[#allocation5 + $0xa4c] ss:$28 sps:$4 sm:$0xff]  }
  0xe5   :  { %2568 = vmatpush1.bf16.msra.mxu1 %v4473_v42  ;;  %2418 = vmatprep.subr.bf16.mxu0 %v4484_v13  ;;  %v4559_v42 = vld [vmem:[#allocation5 + $0x9e4] ss:$28 sps:$4 sm:$0xff]  }
  0xe6   :  { %2578 = vmatprep.subr.bf16.mxu1 %v4481_v43  ;;  %v4560_v13 = vld [vmem:[#allocation5 + $0xa48] ss:$28 sps:$4 sm:$0xff]   ;;  %v4557_v43 = vld [vmem:[#allocation5 + $0x9e0] ss:$28 sps:$4 sm:$0xff]  }
  0xe8   :  { %2570 = vmatmul.mubr.bf16.vlgmr.msra.gmra.mrb[4].mxu1 %v5114_v12  ;;  %2419 = vmatpush1.bf16.msra.mxu0 %v4482_v44  ;;  %v4571_v44 = vld [vmem:[#allocation5 + $0x14] ss:$28 sps:$4 sm:$0xff]  }
  0xe9   :  { %2579 = vmatpush1.bf16.msra.mxu1 %v4479_v45  ;;  %2420 = vmatprep.subr.bf16.mxu0 %v4490_v46  ;;  %v4565_v45 = vld [vmem:[#allocation5 + $0xa1c] ss:$28 sps:$4 sm:$0xff]  }
  0xea   :  { %2580 = vmatprep.subr.bf16.mxu1 %v4487_v47  ;;  %2610 = vmatprep.mubr.bf16.mxu1 %v5116_v37  ;;  %v4563_v46 = vld [vmem:[#allocation5 + $0xa18] ss:$28 sps:$4 sm:$0xff]   ;;  %v5124_v47 = vpack.c.bf16 %v5104_v29, %v5104_v29  ;;  %v4580_v29 = vld [vmem:[#allocation5 + $0xa8c] ss:$28 sps:$4 sm:$0xff]  }
  0xec   :  { %2421 = vmatpush1.bf16.msra.mxu0 %v4488_v48  ;;  %v4569_v48 = vld [vmem:[#allocation5 + $0x10] ss:$28 sps:$4 sm:$0xff]  }
  0xed   :  { %2581 = vmatpush1.bf16.msra.mxu1 %v4485_v49  ;;  %2422 = vmatprep.subr.bf16.mxu0 %v4496_v50  ;;  %v4574_v49 = vld [vmem:[#allocation5 + $0x4c] ss:$28 sps:$4 sm:$0xff]   ;;  %v4568_v50 = vld [vmem:[#allocation5 + $0xa54] ss:$28 sps:$4 sm:$0xff]  }
  0xee   :  { %2582 = vmatprep.subr.bf16.mxu1 %v4493_v51  ;;  %v4566_v51 = vld [vmem:[#allocation5 + $0xa50] ss:$28 sps:$4 sm:$0xff]  }
  0xf0   :  { %2423 = vmatpush1.bf16.msra.mxu0 %v4494_v53  ;;  %v4577_v53 = vld [vmem:[#allocation5 + $0x84] ss:$28 sps:$4 sm:$0xff]  }
  0xf1   :  { %2583 = vmatpush1.bf16.msra.mxu1 %v4491_v52  ;;  %2424 = vmatprep.subr.bf16.mxu0 %v4502_v54  ;;  %v4572_v52 = vld [vmem:[#allocation5 + $0x48] ss:$28 sps:$4 sm:$0xff]   ;;  %v4575_v54 = vld [vmem:[#allocation5 + $0x80] ss:$28 sps:$4 sm:$0xff]  }
  0xf2   :  { %2584 = vmatprep.subr.bf16.mxu1 %v4499_v55  ;;  %v4578_v55 = vld [vmem:[#allocation5 + $0xa88] ss:$28 sps:$4 sm:$0xff]  }
  0xf4   :  { %2425 = vmatpush1.bf16.msra.mxu0 %v4500_v56  ;;  %v4583_v56 = vld [vmem:[#allocation5 + $0xbc] ss:$28 sps:$4 sm:$0xff]  }
  0xf5   :  { %2585 = vmatpush1.bf16.msra.mxu1 %v4497_v57  ;;  %2426 = vmatprep.subr.bf16.mxu0 %v4508_v58  ;;  %v4595_v57 = vld [vmem:[#allocation5 + $0xa94] ss:$28 sps:$4 sm:$0xff]  }
  0xf6   :  { %2586 = vmatprep.subr.bf16.mxu1 %v4505_v59  ;;  %v4581_v58 = vld [vmem:[#allocation5 + $0xb8] ss:$28 sps:$4 sm:$0xff]  }
  0xf7   :  { %v4586_v59 = vld [vmem:[#allocation5 + $0xf4] ss:$28 sps:$4 sm:$0xff]  }
  0xf8   :  { %2427 = vmatpush1.bf16.msra.mxu0 %v4506_v61  ;;  %v4589_v61 = vld [vmem:[#allocation5 + $0x12c] ss:$28 sps:$4 sm:$0xff]  }
  0xf9   :  { %2587 = vmatpush1.bf16.msra.mxu1 %v4503_v60  ;;  %2428 = vmatprep.subr.bf16.mxu0 %v4514_v62  ;;  %v4584_v60 = vld [vmem:[#allocation5 + $0xf0] ss:$28 sps:$4 sm:$0xff]   ;;  %v4587_v62 = vld [vmem:[#allocation5 + $0x128] ss:$28 sps:$4 sm:$0xff]  }
  0xfa   :  { %2588 = vmatprep.subr.bf16.mxu1 %v4511_v1  ;;  %v4592_v1 = vld [vmem:[#allocation5 + $0x164] ss:$28 sps:$4 sm:$0xff]  }
  0xfc   :  { %2429 = vmatpush1.bf16.msra.mxu0 %v4512_v4  ;;  %v4599_v4 = vld [vmem:[#allocation5 + $0x1d8] ss:$28 sps:$4 sm:$0xff]  }
  0xfd   :  { %2589 = vmatpush1.bf16.msra.mxu1 %v4509_v2  ;;  %2430 = vmatprep.subr.bf16.mxu0 %v4520_v5  ;;  %v4593_v2 = vld [vmem:[#allocation5 + $0xa90] ss:$28 sps:$4 sm:$0xff]   ;;  %v4590_v5 = vld [vmem:[#allocation5 + $0x160] ss:$28 sps:$4 sm:$0xff]  }
  0xfe   :  { %2590 = vmatprep.subr.bf16.mxu1 %v4517_v7  ;;  %v4598_v7 = vld [vmem:[#allocation5 + $0x19c] ss:$28 sps:$4 sm:$0xff]  }
 0x100   :  { %2431 = vmatpush1.bf16.msra.mxu0 %v4518_v9  ;;  %v4600_v9 = vld [vmem:[#allocation5 + $0x18] ss:$28 sps:$4 sm:$0xff]  }
 0x101   :  { %2591 = vmatpush1.bf16.msra.mxu1 %v4515_v8  ;;  %2432 = vmatprep.subr.bf16.mxu0 %v4526_v10  ;;  %v4596_v8 = vld [vmem:[#allocation5 + $0x198] ss:$28 sps:$4 sm:$0xff]  }
 0x102   :  { %2592 = vmatprep.subr.bf16.mxu1 %v4523_v11  ;;  %v4603_v10 = vld [vmem:[#allocation5 + $0x1d4] ss:$28 sps:$4 sm:$0xff]  }
 0x103   :  { %v4604_v11 = vld [vmem:[#allocation5 + $0x210] ss:$28 sps:$4 sm:$0xff]  }
 0x104   :  { %2433 = vmatpush1.bf16.msra.mxu0 %v4524_v16 }
 0x105   :  { %2593 = vmatpush1.bf16.msra.mxu1 %v4521_v15  ;;  %2434 = vmatprep.subr.bf16.mxu0 %v4532_v17  ;;  %v4601_v15 = vld [vmem:[#allocation5 + $0x1d0] ss:$28 sps:$4 sm:$0xff]  }
 0x106   :  { %2594 = vmatprep.subr.bf16.mxu1 %v4529_v18  ;;  %v4605_v17 = vld [vmem:[#allocation5 + $0x50] ss:$28 sps:$4 sm:$0xff]  }
 0x107   :  { %v4608_v18 = vld [vmem:[#allocation5 + $0x20c] ss:$28 sps:$4 sm:$0xff]  }
 0x108   :  { %2435 = vmatpush1.bf16.msra.mxu0 %v4530_v19 }
 0x109   :  { %2595 = vmatpush1.bf16.msra.mxu1 %v4527_v20  ;;  %2436 = vmatprep.subr.bf16.mxu0 %v4538_v22  ;;  %v4609_v20 = vld [vmem:[#allocation5 + $0x248] ss:$28 sps:$4 sm:$0xff]  }
 0x10a   :  { %2596 = vmatprep.subr.bf16.mxu1 %v4535_v23  ;;  %v4606_v23 = vld [vmem:[#allocation5 + $0x208] ss:$28 sps:$4 sm:$0xff]  }
 0x10c   :  { %2437 = vmatpush1.bf16.msra.mxu0 %v4536_v27  ;;  %v4613_v27 = vld [vmem:[#allocation5 + $0x244] ss:$28 sps:$4 sm:$0xff]  }
 0x10d   :  { %2597 = vmatpush1.bf16.msra.mxu1 %v4533_v25  ;;  %2438 = vmatprep.subr.bf16.mxu0 %v4544_v28  ;;  %v4610_v25 = vld [vmem:[#allocation5 + $0x88] ss:$28 sps:$4 sm:$0xff]   ;;  %v4614_v28 = vld [vmem:[#allocation5 + $0x280] ss:$28 sps:$4 sm:$0xff]  }
 0x10e   :  { %2598 = vmatprep.subr.bf16.mxu1 %v4541_v30  ;;  %v4611_v30 = vld [vmem:[#allocation5 + $0x240] ss:$28 sps:$4 sm:$0xff]  }
 0x110   :  { %2439 = vmatpush1.bf16.msra.mxu0 %v4542_v32  ;;  %v4618_v32 = vld [vmem:[#allocation5 + $0x27c] ss:$28 sps:$4 sm:$0xff]  }
 0x111   :  { %2599 = vmatpush1.bf16.msra.mxu1 %v4539_v31  ;;  %2440 = vmatprep.subr.bf16.mxu0 %v4550_v33  ;;  %v4615_v31 = vld [vmem:[#allocation5 + $0xc0] ss:$28 sps:$4 sm:$0xff]   ;;  %v4619_v33 = vld [vmem:[#allocation5 + $0x2b8] ss:$28 sps:$4 sm:$0xff]  }
 0x112   :  { %2600 = vmatprep.subr.bf16.mxu1 %v4547_v34  ;;  %v4616_v34 = vld [vmem:[#allocation5 + $0x278] ss:$28 sps:$4 sm:$0xff]  }
 0x114   :  { %2441 = vmatpush1.bf16.msra.mxu0 %v4548_v36  ;;  %v4624_v36 = vld [vmem:[#allocation5 + $0x2f0] ss:$28 sps:$4 sm:$0xff]  }
 0x115   :  { %2601 = vmatpush1.bf16.msra.mxu1 %v4545_v35  ;;  %2442 = vmatprep.subr.bf16.mxu0 %v4556_v14  ;;  %v4623_v35 = vld [vmem:[#allocation5 + $0x2b4] ss:$28 sps:$4 sm:$0xff]  }
 0x116   :  { %2602 = vmatprep.subr.bf16.mxu1 %v4553_v38  ;;  %v4621_v14 = vld [vmem:[#allocation5 + $0x2b0] ss:$28 sps:$4 sm:$0xff]  }
 0x117   :  { %v4625_v38 = vld [vmem:[#allocation5 + $0x130] ss:$28 sps:$4 sm:$0xff]  }
 0x118   :  { %2443 = vmatpush1.bf16.msra.mxu0 %v4554_v40  ;;  %v4629_v40 = vld [vmem:[#allocation5 + $0x328] ss:$28 sps:$4 sm:$0xff]  }
 0x119   :  { %2603 = vmatpush1.bf16.msra.mxu1 %v4551_v39  ;;  %2444 = vmatprep.subr.bf16.mxu0 %v4562_v41  ;;  %v4628_v39 = vld [vmem:[#allocation5 + $0x2ec] ss:$28 sps:$4 sm:$0xff]  }
 0x11a   :  { %2604 = vmatprep.subr.bf16.mxu1 %v4559_v42  ;;  %v4626_v41 = vld [vmem:[#allocation5 + $0x2e8] ss:$28 sps:$4 sm:$0xff]  }
 0x11b   :  { %v4630_v42 = vld [vmem:[#allocation5 + $0x168] ss:$28 sps:$4 sm:$0xff]  }
 0x11c   :  { %2445 = vmatpush1.bf16.msra.mxu0 %v4560_v13  ;;  %v4633_v13 = vld [vmem:[#allocation5 + $0x324] ss:$28 sps:$4 sm:$0xff]  }
 0x11d   :  { %2605 = vmatpush1.bf16.msra.mxu1 %v4557_v43  ;;  %2660 = vmatprep.subr.bf16.mxu0 %v4571_v44  ;;  %v4634_v43 = vld [vmem:[#allocation5 + $0x360] ss:$28 sps:$4 sm:$0xff]  }
 0x11e   :  { %2606 = vmatprep.subr.bf16.mxu1 %v4565_v45  ;;  %v4631_v44 = vld [vmem:[#allocation5 + $0x320] ss:$28 sps:$4 sm:$0xff]  }
 0x11f   :  { %2447 = vmatmul.mubr.bf16.vlgmr.msra.gmra.mrb[0].mxu0 %v5124_v47  ;;  %v4635_v45 = vld [vmem:[#allocation5 + $0x1a0] ss:$28 sps:$4 sm:$0xff]  }
 0x120   :  { %2661 = vmatpush1.bf16.msra.mxu0 %v4569_v48  ;;  %2692 = vmatprep.mubr.bf16.mxu0 %v5089_v63  ;;  %v4639_v48 = vld [vmem:[#allocation5 + $0x558] ss:$28 sps:$4 sm:$0xff]  }
 0x121   :  { %2607 = vmatpush1.bf16.msra.mxu1 %v4563_v46  ;;  %2662 = vmatprep.subr.bf16.mxu0 %v4574_v49  ;;  %v4638_v46 = vld [vmem:[#allocation5 + $0x35c] ss:$28 sps:$4 sm:$0xff]  }
 0x122   :  { %2608 = vmatprep.subr.bf16.mxu1 %v4568_v50  ;;  %v4636_v49 = vld [vmem:[#allocation5 + $0x358] ss:$28 sps:$4 sm:$0xff]  }
 0x123   :  { %v4640_v50 = vld [vmem:[#allocation5 + $0x398] ss:$28 sps:$4 sm:$0xff]  }
 0x124   :  { %2663 = vmatpush1.bf16.msra.mxu0 %v4572_v52  ;;  %v4644_v52 = vld [vmem:[#allocation5 + $0x590] ss:$28 sps:$4 sm:$0xff]  }
 0x125   :  { %2609 = vmatpush1.bf16.msra.mxu1 %v4566_v51  ;;  %2664 = vmatprep.subr.bf16.mxu0 %v4577_v53  ;;  %v4643_v51 = vld [vmem:[#allocation5 + $0x394] ss:$28 sps:$4 sm:$0xff]  }
 0x126   :  { %2619 = vmatprep.subr.bf16.mxu1 %v4580_v29  ;;  %v4641_v53 = vld [vmem:[#allocation5 + $0x390] ss:$28 sps:$4 sm:$0xff]  }
 0x127   :  { %v4645_v29 = vld [vmem:[#allocation5 + $0x3d0] ss:$28 sps:$4 sm:$0xff]  }
 0x128   :  { %2611 = vmatmul.mubr.bf16.vlgmr.msra.gmra.mrb[4].mxu1 %v5124_v47  ;;  %2665 = vmatpush1.bf16.msra.mxu0 %v4575_v54  ;;  %v4648_v54 = vld [vmem:[#allocation5 + $0x3cc] ss:$28 sps:$4 sm:$0xff]  }
 0x129   :  { %2666 = vmatprep.subr.bf16.mxu0 %v4583_v56  ;;  %2620 = vmatpush1.bf16.msra.mxu1 %v4578_v55  ;;  %v4649_v55 = vld [vmem:[#allocation5 + $0x5c8] ss:$28 sps:$4 sm:$0xff]  }
 0x12a   :  { %2651 = vmatprep.mubr.bf16.mxu1 %v4977_v0  ;;  %2783 = vmatprep.subr.bf16.mxu1 %v4595_v57  ;;  %v4646_v56 = vld [vmem:[#allocation5 + $0x3c8] ss:$28 sps:$4 sm:$0xff]  }
 0x12b   :  { %v4650_v57 = vld [vmem:[#allocation5 + $0x408] ss:$28 sps:$4 sm:$0xff]  }
 0x12c   :  { %2667 = vmatpush1.bf16.msra.mxu0 %v4581_v58  ;;  %v4653_v58 = vld [vmem:[#allocation5 + $0x404] ss:$28 sps:$4 sm:$0xff]  }
 0x12d   :  { %2668 = vmatprep.subr.bf16.mxu0 %v4586_v59  ;;  %v4651_v59 = vld [vmem:[#allocation5 + $0x400] ss:$28 sps:$4 sm:$0xff]  }
 0x130   :  { %2669 = vmatpush1.bf16.msra.mxu0 %v4584_v60  ;;  %v4654_v60 = vld [vmem:[#allocation5 + $0x600] ss:$28 sps:$4 sm:$0xff]  }
 0x131   :  { %2670 = vmatprep.subr.bf16.mxu0 %v4589_v61  ;;  %v4655_v61 = vld [vmem:[#allocation5 + $0x440] ss:$28 sps:$4 sm:$0xff]  }
 0x134   :  { %3995 = vmatmul.mubr.msk.bf16.vlgmr.msra.gmra.mrb[4].mxu1 %vm2328_vm0, %v5084_v21  ;;  %2671 = vmatpush1.bf16.msra.mxu0 %v4587_v62  ;;  %v4658_v62 = vld [vmem:[#allocation5 + $0x43c] ss:$28 sps:$4 sm:$0xff]  }
 0x135   :  { %2672 = vmatprep.subr.bf16.mxu0 %v4592_v1  ;;  %2784 = vmatpush1.bf16.msra.mxu1 %v4593_v2  ;;  %v4659_v1 = vld [vmem:[#allocation5 + $0x638] ss:$28 sps:$4 sm:$0xff]  }
 0x136   :  { %2815 = vmatprep.mubr.bf16.mxu1 %v4977_v0  ;;  %4055 = vmatprep.subr.bf16.mxu1 %v4599_v4  ;;  %v4656_v2 = vld [vmem:[#allocation5 + $0x438] ss:$28 sps:$4 sm:$0xff]  }
 0x137   :  { %v4663_v4 = vld [vmem:[#allocation5 + $0x474] ss:$28 sps:$4 sm:$0xff]  }
 0x138   :  { %2673 = vmatpush1.bf16.msra.mxu0 %v4590_v5  ;;  %v4664_v5 = vld [vmem:[#allocation5 + $0x670] ss:$28 sps:$4 sm:$0xff]  }
 0x139   :  { %2674 = vmatprep.subr.bf16.mxu0 %v4598_v7  ;;  %v4665_v7 = vld [vmem:[#allocation5 + $0x4b0] ss:$28 sps:$4 sm:$0xff]  }
 0x13b   :  { %v5133_v16 = vpop.f32.mrb[0].mxu1 }
 0x13c   :  { %2675 = vmatpush1.bf16.msra.mxu0 %v4596_v8  ;;  %3996 = vmatmul.mubr.msk.bf16.vlgmr.msra.gmra.mrb[8].mxu1 %vm2328_vm0, %v5084_v21  ;;  %v5137_v19 = vpop.f32.mrb[1].mxu1  ;;  %v4668_v8 = vld [vmem:[#allocation5 + $0x4ac] ss:$28 sps:$4 sm:$0xff]  }
 0x13d   :  { %4056 = vmatpush3.bf16.msra.mxu1 %v4600_v9  ;;  %2676 = vmatprep.subr.bf16.mxu0 %v4603_v10  ;;  %v2493_v0 = vpop.f32.mrb[2].mxu1  ;;  %v4669_v9 = vld [vmem:[#allocation5 + $0x6a8] ss:$28 sps:$4 sm:$0xff]  }
 0x13e   :  { %4057 = vmatprep.subr.bf16.mxu1 %v4604_v11  ;;  %2856 = vmatprep.mubr.bf16.mxu1 %v5089_v63  ;;  %v2494_v22 = vpop.f32.mrb[3].mxu1  ;;  %v4620_v63 = vld [vmem:[#allocation5 + $0xf8] ss:$28 sps:$4 sm:$0xff]   ;;  %v4666_v10 = vld [vmem:[#allocation5 + $0x4a8] ss:$28 sps:$4 sm:$0xff]  }
 0x13f   :  { %v4670_v11 = vld [vmem:[#allocation5 + $0x4e8] ss:$28 sps:$4 sm:$0xff]   ;;  %v4675_v0 = vld [vmem:[#allocation5 + $0x520] ss:$28 sps:$4 sm:$0xff]   ;;  %v4679_v22 = vld [vmem:[#allocation5 + $0x8d8] ss:$28 sps:$4 sm:$0xff]  }
 0x140   :  { %2677 = vmatpush1.bf16.msra.mxu0 %v4601_v15  ;;  %v4673_v15 = vld [vmem:[#allocation5 + $0x4e4] ss:$28 sps:$4 sm:$0xff]  }
 0x141   :  { %4058 = vmatpush3.bf16.msra.mxu1 %v4605_v17  ;;  %2678 = vmatprep.subr.bf16.mxu0 %v4608_v18  ;;  %v4674_v17 = vld [vmem:[#allocation5 + $0x6e0] ss:$28 sps:$4 sm:$0xff]  }
 0x142   :  { %4059 = vmatprep.subr.bf16.mxu1 %v4609_v20  ;;  %v4671_v18 = vld [vmem:[#allocation5 + $0x4e0] ss:$28 sps:$4 sm:$0xff]  }
 0x143   :  { %v4678_v20 = vld [vmem:[#allocation5 + $0x51c] ss:$28 sps:$4 sm:$0xff]  }
 0x144   :  { %2679 = vmatpush1.bf16.msra.mxu0 %v4606_v23  ;;  %v4676_v23 = vld [vmem:[#allocation5 + $0x518] ss:$28 sps:$4 sm:$0xff]  }
 0x145   :  { %4060 = vmatpush3.bf16.msra.mxu1 %v4610_v25  ;;  %2680 = vmatprep.subr.bf16.mxu0 %v4613_v27  ;;  %v4680_v25 = vld [vmem:[#allocation5 + $0x718] ss:$28 sps:$4 sm:$0xff]  }
 0x146   :  { %4061 = vmatprep.subr.bf16.mxu1 %v4614_v28  ;;  %v4683_v27 = vld [vmem:[#allocation5 + $0x554] ss:$28 sps:$4 sm:$0xff]  }
 0x147   :  { %v4684_v28 = vld [vmem:[#allocation5 + $0x910] ss:$28 sps:$4 sm:$0xff]  }
 0x148   :  { %2681 = vmatpush1.bf16.msra.mxu0 %v4611_v30  ;;  %v4681_v30 = vld [vmem:[#allocation5 + $0x550] ss:$28 sps:$4 sm:$0xff]  }
 0x149   :  { %4062 = vmatpush3.bf16.msra.mxu1 %v4615_v31  ;;  %2682 = vmatprep.subr.bf16.mxu0 %v4618_v32  ;;  %v4685_v31 = vld [vmem:[#allocation5 + $0x750] ss:$28 sps:$4 sm:$0xff]  }
 0x14a   :  { %4063 = vmatprep.subr.bf16.mxu1 %v4619_v33  ;;  %v4688_v32 = vld [vmem:[#allocation5 + $0x58c] ss:$28 sps:$4 sm:$0xff]  }
 0x14b   :  { %v4689_v33 = vld [vmem:[#allocation5 + $0x948] ss:$28 sps:$4 sm:$0xff]  }
 0x14c   :  { %2683 = vmatpush1.bf16.msra.mxu0 %v4616_v34  ;;  %v4686_v34 = vld [vmem:[#allocation5 + $0x588] ss:$28 sps:$4 sm:$0xff]  }
 0x14d   :  { %4064 = vmatpush3.bf16.msra.mxu1 %v4620_v63  ;;  %2684 = vmatprep.subr.bf16.mxu0 %v4623_v35  ;;  %v4690_v63 = vld [vmem:[#allocation5 + $0x788] ss:$28 sps:$4 sm:$0xff]  }
 0x14e   :  { %4065 = vmatprep.subr.bf16.mxu1 %v4624_v36  ;;  %v4693_v35 = vld [vmem:[#allocation5 + $0x5c4] ss:$28 sps:$4 sm:$0xff]  }
 0x14f   :  { %v4694_v36 = vld [vmem:[#allocation5 + $0x980] ss:$28 sps:$4 sm:$0xff]  }
 0x150   :  { %2685 = vmatpush1.bf16.msra.mxu0 %v4621_v14  ;;  %v4691_v14 = vld [vmem:[#allocation5 + $0x5c0] ss:$28 sps:$4 sm:$0xff]  }
 0x151   :  { %4066 = vmatpush3.bf16.msra.mxu1 %v4625_v38  ;;  %2686 = vmatprep.subr.bf16.mxu0 %v4628_v39  ;;  %v4695_v38 = vld [vmem:[#allocation5 + $0x7c0] ss:$28 sps:$4 sm:$0xff]  }
 0x152   :  { %4067 = vmatprep.subr.bf16.mxu1 %v4629_v40  ;;  %v4698_v39 = vld [vmem:[#allocation5 + $0x5fc] ss:$28 sps:$4 sm:$0xff]  }
 0x153   :  { %v4699_v40 = vld [vmem:[#allocation5 + $0x9b8] ss:$28 sps:$4 sm:$0xff]  }
 0x154   :  { %2687 = vmatpush1.bf16.msra.mxu0 %v4626_v41  ;;  %v4696_v41 = vld [vmem:[#allocation5 + $0x5f8] ss:$28 sps:$4 sm:$0xff]  }
 0x155   :  { %4068 = vmatpush3.bf16.msra.mxu1 %v4630_v42  ;;  %2688 = vmatprep.subr.bf16.mxu0 %v4633_v13  ;;  %v4700_v42 = vld [vmem:[#allocation5 + $0x7f8] ss:$28 sps:$4 sm:$0xff]  }
 0x156   :  { %4069 = vmatprep.subr.bf16.mxu1 %v4634_v43  ;;  %v4703_v13 = vld [vmem:[#allocation5 + $0x634] ss:$28 sps:$4 sm:$0xff]  }
 0x157   :  { %v4704_v43 = vld [vmem:[#allocation5 + $0x9f0] ss:$28 sps:$4 sm:$0xff]  }
 0x158   :  { %2689 = vmatpush1.bf16.msra.mxu0 %v4631_v44  ;;  %v4701_v44 = vld [vmem:[#allocation5 + $0x630] ss:$28 sps:$4 sm:$0xff]  }
 0x159   :  { %4070 = vmatpush3.bf16.msra.mxu1 %v4635_v45  ;;  %2690 = vmatprep.subr.bf16.mxu0 %v4638_v46  ;;  %v4705_v45 = vld [vmem:[#allocation5 + $0x830] ss:$28 sps:$4 sm:$0xff]  }
 0x15a   :  { %4077 = vmatprep.subr.bf16.mxu1 %v4639_v48  ;;  %v4708_v46 = vld [vmem:[#allocation5 + $0x66c] ss:$28 sps:$4 sm:$0xff]  }
 0x15b   :  { %v4709_v48 = vld [vmem:[#allocation5 + $0xa28] ss:$28 sps:$4 sm:$0xff]  }
 0x15c   :  { %2691 = vmatpush1.bf16.msra.mxu0 %v4636_v49  ;;  %2857 = vmatmul.mubr.bf16.vlgmr.msra.gmra.mrb[12].mxu1 %v5098_v24  ;;  %v4706_v49 = vld [vmem:[#allocation5 + $0x668] ss:$28 sps:$4 sm:$0xff]  }
 0x15d   :  { %4078 = vmatpush3.bf16.msra.mxu1 %v4640_v50  ;;  %2701 = vmatprep.subr.bf16.mxu0 %v4643_v51  ;;  %v4710_v50 = vld [vmem:[#allocation5 + $0x868] ss:$28 sps:$4 sm:$0xff]  }
 0x15e   :  { %4079 = vmatprep.subr.bf16.mxu1 %v4644_v52  ;;  %2896 = vmatprep.mubr.bf16.mxu1 %v5100_v26  ;;  %v4713_v51 = vld [vmem:[#allocation5 + $0x6a4] ss:$28 sps:$4 sm:$0xff]  }
 0x15f   :  { %2693 = vmatmul.mubr.bf16.vlgmr.msra.gmra.mrb[4].mxu0 %v5098_v24  ;;  %v4660_v24 = vld [vmem:[#allocation5 + $0x478] ss:$28 sps:$4 sm:$0xff]   ;;  %v4714_v52 = vld [vmem:[#allocation5 + $0xa60] ss:$28 sps:$4 sm:$0xff]  }
 0x160   :  { %2702 = vmatpush1.bf16.msra.mxu0 %v4641_v53  ;;  %2733 = vmatprep.mubr.bf16.mxu0 %v5100_v26  ;;  %v4661_v26 = vld [vmem:[#allocation5 + $0x470] ss:$28 sps:$4 sm:$0xff]   ;;  %v4711_v53 = vld [vmem:[#allocation5 + $0x6a0] ss:$28 sps:$4 sm:$0xff]  }
 0x161   :  { %4080 = vmatpush3.bf16.msra.mxu1 %v4645_v29  ;;  %2703 = vmatprep.subr.bf16.mxu0 %v4648_v54  ;;  %v4715_v29 = vld [vmem:[#allocation5 + $0x8a0] ss:$28 sps:$4 sm:$0xff]  }
 0x162   :  { %4081 = vmatprep.subr.bf16.mxu1 %v4649_v55  ;;  %v4718_v54 = vld [vmem:[#allocation5 + $0x6dc] ss:$28 sps:$4 sm:$0xff]  }
 0x163   :  { %v4716_v55 = vld [vmem:[#allocation5 + $0x6d8] ss:$28 sps:$4 sm:$0xff]  }
 0x164   :  { %2704 = vmatpush1.bf16.msra.mxu0 %v4646_v56  ;;  %v4721_v56 = vld [vmem:[#allocation5 + $0x714] ss:$28 sps:$4 sm:$0xff]  }
 0x165   :  { %4082 = vmatpush3.bf16.msra.mxu1 %v4650_v57  ;;  %2705 = vmatprep.subr.bf16.mxu0 %v4653_v58  ;;  %v4722_v57 = vld [vmem:[#allocation5 + $0xa98] ss:$28 sps:$4 sm:$0xff]   ;;  %v4979_v58 = vmov 0.0  }
 0x166   :  { %4083 = vmatprep.subr.bf16.mxu1 %v4654_v60  ;;  %v4719_v60 = vld [vmem:[#allocation5 + $0x710] ss:$28 sps:$4 sm:$0xff]  }
 0x168   :  { %2706 = vmatpush1.bf16.msra.mxu0 %v4651_v59  ;;  %v4768_v59 = vld [vmem:[#allocation8 + $0x40] sm:$0xff]  }
 0x169   :  { %4084 = vmatpush3.bf16.msra.mxu1 %v4655_v61  ;;  %2707 = vmatprep.subr.bf16.mxu0 %v4658_v62  ;;  %v4725_v61 = vld [vmem:[#allocation5 + $0x74c] ss:$28 sps:$4 sm:$0xff]  }
 0x16a   :  { %4085 = vmatprep.subr.bf16.mxu1 %v4659_v1  ;;  %v4723_v62 = vld [vmem:[#allocation5 + $0x748] ss:$28 sps:$4 sm:$0xff]  }
 0x16b   :  { %v4728_v1 = vld [vmem:[#allocation5 + $0x784] ss:$28 sps:$4 sm:$0xff]  }
 0x16c   :  { %2708 = vmatpush1.bf16.msra.mxu0 %v4656_v2  ;;  %v4769_v2 = vld [vmem:[#allocation8] sm:$0xff]  }
 0x16d   :  { %4086 = vmatpush3.bf16.msra.mxu1 %v4660_v24  ;;  %2709 = vmatprep.subr.bf16.mxu0 %v4663_v4  ;;  %v4770_v24 = vld [vmem:[#allocation8 + $0x48] sm:$0xff]   ;;  %v4726_v4 = vld [vmem:[#allocation5 + $0x780] ss:$28 sps:$4 sm:$0xff]  }
 0x16e   :  { %4087 = vmatprep.subr.bf16.mxu1 %v4664_v5  ;;  %v4731_v5 = vld [vmem:[#allocation5 + $0x7bc] ss:$28 sps:$4 sm:$0xff]  }
 0x170   :  { %2710 = vmatpush1.bf16.msra.mxu0 %v4661_v26  ;;  %v4771_v26 = vld [vmem:[#allocation8 + $0x8] sm:$0xff]  }
 0x171   :  { %4088 = vmatpush3.bf16.msra.mxu1 %v4665_v7  ;;  %2711 = vmatprep.subr.bf16.mxu0 %v4668_v8  ;;  %v4772_v7 = vld [vmem:[#allocation8 + $0x50] sm:$0xff]  }
 0x172   :  { %4089 = vmatprep.subr.bf16.mxu1 %v4669_v9  ;;  %v4734_v8 = vld [vmem:[#allocation5 + $0x7f4] ss:$28 sps:$4 sm:$0xff]   ;;  %v4774_v9 = vld [vmem:[#allocation8 + $0x58] sm:$0xff]  }
 0x174   :  { %2712 = vmatpush1.bf16.msra.mxu0 %v4666_v10  ;;  %v4732_v10 = vld [vmem:[#allocation5 + $0x7f0] ss:$28 sps:$4 sm:$0xff]  }
 0x175   :  { %4090 = vmatpush3.bf16.msra.mxu1 %v4670_v11  ;;  %2713 = vmatprep.subr.bf16.mxu0 %v4673_v15  ;;  %v4737_v11 = vld [vmem:[#allocation5 + $0x82c] ss:$28 sps:$4 sm:$0xff]   ;;  %v4776_v15 = vld [vmem:[#allocation8 + $0x60] sm:$0xff]  }
 0x176   :  { %4091 = vmatprep.subr.bf16.mxu1 %v4674_v17  ;;  %v4735_v17 = vld [vmem:[#allocation5 + $0x828] ss:$28 sps:$4 sm:$0xff]  }
 0x178   :  { %2714 = vmatpush1.bf16.msra.mxu0 %v4671_v18  ;;  %v4740_v18 = vld [vmem:[#allocation5 + $0x864] ss:$28 sps:$4 sm:$0xff]  }
 0x179   :  { %4092 = vmatpush3.bf16.msra.mxu1 %v4675_v0  ;;  %2715 = vmatprep.subr.bf16.mxu0 %v4678_v20  ;;  %v4777_v0 = vld [vmem:[#allocation8 + $0x20] sm:$0xff]   ;;  %v4778_v20 = vld [vmem:[#allocation8 + $0x68] sm:$0xff]  }
 0x17a   :  { %4099 = vmatprep.subr.bf16.mxu1 %v4679_v22  ;;  %v4738_v22 = vld [vmem:[#allocation5 + $0x860] ss:$28 sps:$4 sm:$0xff]  }
 0x17c   :  { %2716 = vmatpush1.bf16.msra.mxu0 %v4676_v23  ;;  %2897 = vmatmul.mubr.bf16.vlgmr.msra.gmra.mrb[16].mxu1 %v5114_v12  ;;  %v4743_v23 = vld [vmem:[#allocation5 + $0x89c] ss:$28 sps:$4 sm:$0xff]  }
 0x17d   :  { %4100 = vmatpush3.bf16.msra.mxu1 %v4680_v25  ;;  %2717 = vmatprep.subr.bf16.mxu0 %v4683_v27  ;;  %v4779_v25 = vld [vmem:[#allocation8 + $0x28] sm:$0xff]   ;;  %v4780_v27 = vld [vmem:[#allocation8 + $0x70] sm:$0xff]  }
 0x17e   :  { %4101 = vmatprep.subr.bf16.mxu1 %v4684_v28  ;;  %2936 = vmatprep.mubr.bf16.mxu1 %v5116_v37  ;;  %v4741_v28 = vld [vmem:[#allocation5 + $0x898] ss:$28 sps:$4 sm:$0xff]  }
 0x180   :  { %2718 = vmatpush1.bf16.msra.mxu0 %v4681_v30  ;;  %v4746_v30 = vld [vmem:[#allocation5 + $0x8d4] ss:$28 sps:$4 sm:$0xff]  }
 0x181   :  { %4102 = vmatpush3.bf16.msra.mxu1 %v4685_v31  ;;  %2719 = vmatprep.subr.bf16.mxu0 %v4688_v32  ;;  %v4781_v31 = vld [vmem:[#allocation8 + $0x30] sm:$0xff]   ;;  %v4782_v32 = vld [vmem:[#allocation8 + $0x78] sm:$0xff]  }
 0x182   :  { %4103 = vmatprep.subr.bf16.mxu1 %v4689_v33  ;;  %v4744_v33 = vld [vmem:[#allocation5 + $0x8d0] ss:$28 sps:$4 sm:$0xff]  }
 0x184   :  { %2720 = vmatpush1.bf16.msra.mxu0 %v4686_v34  ;;  %v4749_v34 = vld [vmem:[#allocation5 + $0x90c] ss:$28 sps:$4 sm:$0xff]  }
 0x185   :  { %4104 = vmatpush3.bf16.msra.mxu1 %v4690_v63  ;;  %2721 = vmatprep.subr.bf16.mxu0 %v4693_v35  ;;  %v4783_v63 = vld [vmem:[#allocation8 + $0x38] sm:$0xff]   ;;  %v4784_v35 = vld [vmem:[#allocation8 + $0xc0] sm:$0xff]  }
 0x186   :  { %4105 = vmatprep.subr.bf16.mxu1 %v4694_v36  ;;  %v4747_v36 = vld [vmem:[#allocation5 + $0x908] ss:$28 sps:$4 sm:$0xff]  }
 0x188   :  { %2722 = vmatpush1.bf16.msra.mxu0 %v4691_v14  ;;  %v4752_v14 = vld [vmem:[#allocation5 + $0x944] ss:$28 sps:$4 sm:$0xff]  }
 0x189   :  { %4106 = vmatpush3.bf16.msra.mxu1 %v4695_v38  ;;  %2723 = vmatprep.subr.bf16.mxu0 %v4698_v39  ;;  %v4750_v38 = vld [vmem:[#allocation5 + $0x940] ss:$28 sps:$4 sm:$0xff]  }
 0x18a   :  { %4107 = vmatprep.subr.bf16.mxu1 %v4699_v40  ;;  %v4755_v39 = vld [vmem:[#allocation5 + $0x97c] ss:$28 sps:$4 sm:$0xff]  }
 0x18b   :  { %v4753_v40 = vld [vmem:[#allocation5 + $0x978] ss:$28 sps:$4 sm:$0xff]  }
 0x18c   :  { %2724 = vmatpush1.bf16.msra.mxu0 %v4696_v41  ;;  %v4758_v41 = vld [vmem:[#allocation5 + $0x9b4] ss:$28 sps:$4 sm:$0xff]  }
 0x18d   :  { %4108 = vmatpush3.bf16.msra.mxu1 %v4700_v42  ;;  %2725 = vmatprep.subr.bf16.mxu0 %v4703_v13  ;;  %v4756_v42 = vld [vmem:[#allocation5 + $0x9b0] ss:$28 sps:$4 sm:$0xff]  }
 0x18e   :  { %4109 = vmatprep.subr.bf16.mxu1 %v4704_v43  ;;  %v4761_v13 = vld [vmem:[#allocation5 + $0x9ec] ss:$28 sps:$4 sm:$0xff]  }
 0x18f   :  { %v4759_v43 = vld [vmem:[#allocation5 + $0x9e8] ss:$28 sps:$4 sm:$0xff]  }
 0x190   :  { %2726 = vmatpush1.bf16.msra.mxu0 %v4701_v44  ;;  %v4764_v44 = vld [vmem:[#allocation5 + $0xa24] ss:$28 sps:$4 sm:$0xff]  }
 0x191   :  { %4110 = vmatpush3.bf16.msra.mxu1 %v4705_v45  ;;  %2727 = vmatprep.subr.bf16.mxu0 %v4708_v46  ;;  %v4762_v45 = vld [vmem:[#allocation5 + $0xa20] ss:$28 sps:$4 sm:$0xff]  }
 0x192   :  { %4111 = vmatprep.subr.bf16.mxu1 %v4709_v48  ;;  %v4767_v46 = vld [vmem:[#allocation5 + $0xa5c] ss:$28 sps:$4 sm:$0xff]  }
 0x193   :  { %v4765_v48 = vld [vmem:[#allocation5 + $0xa58] ss:$28 sps:$4 sm:$0xff]  }
 0x194   :  { %2728 = vmatpush1.bf16.msra.mxu0 %v4706_v49  ;;  %v4800_v49 = vld [vmem:[#allocation8 + $0x180] sm:$0xff]  }
 0x195   :  { %4112 = vmatpush3.bf16.msra.mxu1 %v4710_v50  ;;  %2729 = vmatprep.subr.bf16.mxu0 %v4713_v51  ;;  %v4801_v50 = vld [vmem:[#allocation8 + $0x188] sm:$0xff]   ;;  %v4802_v51 = vld [vmem:[#allocation8 + $0x190] sm:$0xff]  }
 0x196   :  { %4113 = vmatprep.subr.bf16.mxu1 %v4714_v52  ;;  %v4803_v52 = vld [vmem:[#allocation8 + $0x198] sm:$0xff]  }
 0x198   :  { %2730 = vmatpush1.bf16.msra.mxu0 %v4711_v53  ;;  %v531_v53 = vsub.s32 0, %v5074_v6 }
 0x199   :  { %4114 = vmatpush3.bf16.msra.mxu1 %v4715_v29  ;;  %2731 = vmatprep.subr.bf16.mxu0 %v4718_v54  ;;  %v5162_v29 = vld [vmem:[#allocation7] sm:$0xff]  ;;  %v4804_v54 = vld [vmem:[#allocation8 + $0x1a0] sm:$0xff]  }
 0x19a   :  { %4198 = vmatprep.subr.bf16.mxu1 %v4979_v58 }
 0x19c   :  { %2732 = vmatpush1.bf16.msra.mxu0 %v4716_v55  ;;  %2937 = vmatmul.mubr.bf16.vlgmr.msra.gmra.mrb[20].mxu1 %v5124_v47  ;;  %v532_v55 = vrot.slane %v5162_v29, %v531_v53  ;;  %v4816_v53 = vld [vmem:[#allocation8 + $0x160] sm:$0xff]  }
 0x19d   :  { %2742 = vmatprep.subr.bf16.mxu0 %v4721_v56  ;;  %4199 = vmatpush3.bf16.msra.mxu1 %v4722_v57  ;;  %v4805_v57 = vld [vmem:[#allocation8 + $0x1a8] sm:$0xff]  }
 0x19e   :  { %4200 = vmatprep.mubr.msk.bf16.mxu1 %vm4980_vm1, %v4979_v58  ;;  %4123 = vmatprep.subr.bf16.mxu1 %v4768_v59 }
 0x19f   :  { %2734 = vmatmul.mubr.bf16.vlgmr.msra.gmra.mrb[4].mxu0 %v5114_v12  ;;  %v4729_v12 = vld [vmem:[#allocation5 + $0x7b8] ss:$28 sps:$4 sm:$0xff]  }
 0x1a0   :  { %2743 = vmatpush1.bf16.msra.mxu0 %v4719_v60  ;;  %2774 = vmatprep.mubr.bf16.mxu0 %v5116_v37  ;;  %v4773_v37 = vld [vmem:[#allocation8 + $0x10] sm:$0xff]  }
 0x1a1   :  { %2744 = vmatprep.subr.bf16.mxu0 %v4725_v61 }
 0x1a4   :  { %2745 = vmatpush1.bf16.msra.mxu0 %v4723_v62  ;;  %4201 = vmatmul.mubr.msk.bf16.vlgmr.msra.gmra.mrb[24].mxu1 %vm2328_vm0, %v5084_v21  ;;  %v4775_v21 = vld [vmem:[#allocation8 + $0x18] sm:$0xff]  }
 0x1a5   :  { %2746 = vmatprep.subr.bf16.mxu0 %v4728_v1  ;;  %4124 = vmatpush3.bf16.msra.mxu1 %v4769_v2 }
 0x1a6   :  { %4125 = vmatprep.subr.bf16.mxu1 %v4770_v24 }
 0x1a8   :  { %2747 = vmatpush1.bf16.msra.mxu0 %v4726_v4 }
 0x1a9   :  { %2748 = vmatprep.subr.bf16.mxu0 %v4731_v5  ;;  %4126 = vmatpush3.bf16.msra.mxu1 %v4771_v26 }
 0x1aa   :  { %4127 = vmatprep.subr.bf16.mxu1 %v4772_v7 }
 0x1ac   :  { %2749 = vmatpush1.bf16.msra.mxu0 %v4729_v12  ;;  %v4785_v12 = vld [vmem:[#allocation8 + $0x80] sm:$0xff]  }
 0x1ad   :  { %2750 = vmatprep.subr.bf16.mxu0 %v4734_v8  ;;  %4128 = vmatpush3.bf16.msra.mxu1 %v4773_v37  ;;  %v4786_v37 = vld [vmem:[#allocation8 + $0xc8] sm:$0xff]  }
 0x1ae   :  { %4129 = vmatprep.subr.bf16.mxu1 %v4774_v9  ;;  %v4806_v9 = vld [vmem:[#allocation8 + $0x1b0] sm:$0xff]  }
 0x1b0   :  { %2751 = vmatpush1.bf16.msra.mxu0 %v4732_v10  ;;  %v4787_v10 = vld [vmem:[#allocation8 + $0x88] sm:$0xff]  }
 0x1b1   :  { %2752 = vmatprep.subr.bf16.mxu0 %v4737_v11  ;;  %4130 = vmatpush3.bf16.msra.mxu1 %v4775_v21  ;;  %v4807_v11 = vld [vmem:[#allocation8 + $0x1b8] sm:$0xff]   ;;  %v543_v21 = vsub.s32 3, %v5074_v6 }
 0x1b2   :  { %4131 = vmatprep.subr.bf16.mxu1 %v4776_v15  ;;  %v4790_v15 = vld [vmem:[#allocation8 + $0xd8] sm:$0xff]  }
 0x1b4   :  { %2753 = vmatpush1.bf16.msra.mxu0 %v4735_v17  ;;  %v544_v17 = vrot.slane %v5162_v29, %v543_v21 }
 0x1b5   :  { %2754 = vmatprep.subr.bf16.mxu0 %v4740_v18  ;;  %4132 = vmatpush3.bf16.msra.mxu1 %v4777_v0  ;;  %v4791_v18 = vld [vmem:[#allocation8 + $0x98] sm:$0xff]  }
 0x1b6   :  { %4133 = vmatprep.subr.bf16.mxu1 %v4778_v20  ;;  %v4792_v20 = vld [vmem:[#allocation8 + $0xe0] sm:$0xff]  }
 0x1b8   :  { %2755 = vmatpush1.bf16.msra.mxu0 %v4738_v22 }
 0x1b9   :  { %2756 = vmatprep.subr.bf16.mxu0 %v4743_v23  ;;  %4134 = vmatpush3.bf16.msra.mxu1 %v4779_v25 }
 0x1ba   :  { %4135 = vmatprep.subr.bf16.mxu1 %v4780_v27 }
 0x1bc   :  { %2757 = vmatpush1.bf16.msra.mxu0 %v4741_v28  ;;  %v539_v28 = vsub.s32 2, %v5074_v6 }
 0x1bd   :  { %2758 = vmatprep.subr.bf16.mxu0 %v4746_v30  ;;  %4136 = vmatpush3.bf16.msra.mxu1 %v4781_v31  ;;  %v4794_v31 = vld [vmem:[#allocation8 + $0xe8] sm:$0xff]  }
 0x1be   :  { %4137 = vmatprep.subr.bf16.mxu1 %v4782_v32 }
 0x1c0   :  { %2759 = vmatpush1.bf16.msra.mxu0 %v4744_v33  ;;  %v4795_v33 = vld [vmem:[#allocation8 + $0xa8] sm:$0xff]  }
 0x1c1   :  { %2760 = vmatprep.subr.bf16.mxu0 %v4749_v34  ;;  %4138 = vmatpush3.bf16.msra.mxu1 %v4783_v63  ;;  %v540_v34 = vrot.slane %v5162_v29, %v539_v28  ;;  %v4796_v63 = vld [vmem:[#allocation8 + $0xf0] sm:$0xff]   ;;  %v551_v28 = vsub.s32 5, %v5074_v6 }
 0x1c2   :  { %4145 = vmatprep.subr.bf16.mxu1 %v4784_v35 }
 0x1c4   :  { %2761 = vmatpush1.bf16.msra.mxu0 %v4747_v36 }
 0x1c5   :  { %2762 = vmatprep.subr.bf16.mxu0 %v4752_v14 }
 0x1c8   :  { %2763 = vmatpush1.bf16.msra.mxu0 %v4750_v38  ;;  %v4797_v38 = vld [vmem:[#allocation8 + $0xb0] sm:$0xff]  }
 0x1c9   :  { %2764 = vmatprep.subr.bf16.mxu0 %v4755_v39 }
 0x1cc   :  { %2765 = vmatpush1.bf16.msra.mxu0 %v4753_v40 }
 0x1cd   :  { %2766 = vmatprep.subr.bf16.mxu0 %v4758_v41  ;;  %v4798_v41 = vld [vmem:[#allocation8 + $0xf8] sm:$0xff]  }
 0x1d0   :  { %2767 = vmatpush1.bf16.msra.mxu0 %v4756_v42  ;;  %v4799_v42 = vld [vmem:[#allocation8 + $0xb8] sm:$0xff]  }
 0x1d1   :  { %2768 = vmatprep.subr.bf16.mxu0 %v4761_v13 }
 0x1d4   :  { %2769 = vmatpush1.bf16.msra.mxu0 %v4759_v43  ;;  %v4808_v43 = vld [vmem:[#allocation8 + $0x140] sm:$0xff]  }
 0x1d5   :  { %2770 = vmatprep.subr.bf16.mxu0 %v4764_v44  ;;  %v4809_v44 = vld [vmem:[#allocation8 + $0x100] sm:$0xff]  }
 0x1d8   :  { %2771 = vmatpush1.bf16.msra.mxu0 %v4762_v45 }
 0x1d9   :  { %2772 = vmatprep.subr.bf16.mxu0 %v4767_v46  ;;  %v4810_v46 = vld [vmem:[#allocation8 + $0x148] sm:$0xff]  }
 0x1dc   :  { %2773 = vmatpush1.bf16.msra.mxu0 %v4765_v48  ;;  %v4811_v48 = vld [vmem:[#allocation8 + $0x108] sm:$0xff]  }
 0x1dd   :  { %4204 = vmatprep.subr.bf16.mxu0 %v4979_v58 }
 0x1df   :  { %2775 = vmatmul.mubr.bf16.vlgmr.msra.gmra.mrb[4].mxu0 %v5124_v47  ;;  %v535_v47 = vsub.s32 1, %v5074_v6 }
 0x1e0   :  { %4205 = vmatpush3.bf16.msra.mxu0 %v4800_v49  ;;  %4220 = vmatprep.mubr.msk.bf16.mxu0 %vm4980_vm1, %v4979_v58  ;;  %v4812_v49 = vld [vmem:[#allocation8 + $0x150] sm:$0xff]  }
 0x1e1   :  { %4206 = vmatprep.subr.bf16.mxu0 %v4979_v58  ;;  %v536_v56 = vrot.slane %v5162_v29, %v535_v47  ;;  %v4817_v47 = vld [vmem:[#allocation8 + $0x120] sm:$0xff]  }
 0x1e4   :  { %4207 = vmatpush3.bf16.msra.mxu0 %v4801_v50  ;;  %v4813_v50 = vld [vmem:[#allocation8 + $0x110] sm:$0xff]  }
 0x1e5   :  { %4208 = vmatprep.subr.bf16.mxu0 %v4979_v58 }
 0x1e8   :  { %4209 = vmatpush3.bf16.msra.mxu0 %v4802_v51  ;;  %v4814_v51 = vld [vmem:[#allocation8 + $0x158] sm:$0xff]  }
 0x1e9   :  { %4210 = vmatprep.subr.bf16.mxu0 %v4979_v58 }
 0x1ec   :  { %4211 = vmatpush3.bf16.msra.mxu0 %v4803_v52  ;;  %v4815_v52 = vld [vmem:[#allocation8 + $0x118] sm:$0xff]  }
 0x1ed   :  { %4212 = vmatprep.subr.bf16.mxu0 %v4979_v58 }
 0x1f0   :  { %4213 = vmatpush3.bf16.msra.mxu0 %v4804_v54  ;;  %v4818_v54 = vld [vmem:[#allocation8 + $0x168] sm:$0xff]  }
 0x1f1   :  { %4214 = vmatprep.subr.bf16.mxu0 %v4979_v58 }
 0x1f2   :  { %v2448_v59 = vpop.f32.mrb[0].mxu0 }
 0x1f3   :  { %v4224_v60 = vadd.f32 %v2448_v59, %v532_v55  ;;  %v2450_v61 = vpop.f32.mrb[1].mxu0 }
 0x1f4   :  { %v4226_v62 = vadd.f32 %v2450_v61, %v536_v56  ;;  %v2452_v1 = vpop.f32.mrb[2].mxu0  ;;  %4215 = vmatpush3.bf16.msra.mxu0 %v4805_v57  ;;  %v4819_v61 = vld [vmem:[#allocation8 + $0x128] sm:$0xff]  }
 0x1f5   :  { %v4225_v2 = vadd.f32 %v4224_v60, %v5133_v16  ;;  %v2453_v24 = vpop.f32.mrb[3].mxu0  ;;  %4216 = vmatprep.subr.bf16.mxu0 %v4979_v58  ;;  %v4788_v16 = vld [vmem:[#allocation8 + $0xd0] sm:$0xff]  }
 0x1f6   :  { %v4227_v4 = vadd.f32 %v4226_v62, %v5137_v19  ;;  %v4789_v19 = vld [vmem:[#allocation8 + $0x90] sm:$0xff]   ;;  %v4823_v24 = vld [vmem:[#allocation8 + $0x138] sm:$0xff]  }
 0x1f7   :  { %v2984_v5 = vmax.f32 %v4225_v2, 0.0  ;;  %v4820_v62 = vld [vmem:[#allocation8 + $0x170] sm:$0xff]   ;;  %v4822_v2 = vld [vmem:[#allocation8 + $0x178] sm:$0xff]  }
 0x1f8   :  { %v2985_v26 = vmax.f32 %v4227_v4, 0.0  ;;  %4217 = vmatpush3.bf16.msra.mxu0 %v4806_v9  ;;  %v4821_v1 = vld [vmem:[#allocation8 + $0x130] sm:$0xff]   ;;  %v555_v4 = vsub.s32 6, %v5074_v6 }
 0x1f9   :  { %v2991_v8 = vpack.c.bf16 %v2984_v5, %v2984_v5  ;;  %4218 = vmatprep.subr.bf16.mxu0 %v4979_v58  ;;  %v4793_v58 = vld [vmem:[#allocation8 + $0xa0] sm:$0xff]  }
 0x1fa   :  { %v2992_v7 = vpack.c.bf16 %v2985_v26, %v2985_v26  ;;  %v556_v5 = vrot.slane %v5162_v29, %v555_v4 }
 0x1fc   :  { %3485 = vmatprep.mubr.bf16.mxu1 %v2992_v7  ;;  %4219 = vmatpush3.bf16.msra.mxu0 %v4807_v11 }
 0x1fd   :  { %3486 = vmatmul.mubr.bf16.vlgmr.msra.gmra.mrb[28].mxu1 %v2991_v8 }
 0x1fe   :  { %4146 = vmatpush3.bf16.msra.mxu1 %v4785_v12 }
 0x1ff   :  { %4147 = vmatprep.subr.bf16.mxu1 %v4786_v37 }
 0x202   :  { %4148 = vmatpush3.bf16.msra.mxu1 %v4787_v10 }
 0x203   :  { %4149 = vmatprep.subr.bf16.mxu1 %v4788_v16 }
 0x206   :  { %4150 = vmatpush3.bf16.msra.mxu1 %v4789_v19 }
 0x207   :  { %v2653_v0 = vpop.f32.mrb[4].mxu1  ;;  %4151 = vmatprep.subr.bf16.mxu1 %v4790_v15 }
 0x208   :  { %v2655_v22 = vpop.f32.mrb[5].mxu1  ;;  %v4228_v40 = vadd.f32 %v2653_v0, %v540_v34 }
 0x209   :  { %v4229_v23 = vadd.f32 %v2655_v22, %v544_v17  ;;  %v2657_v25 = vpop.f32.mrb[6].mxu1 }
 0x20a   :  { %v2658_v27 = vpop.f32.mrb[7].mxu1  ;;  %4152 = vmatpush3.bf16.msra.mxu1 %v4791_v18  ;;  %v2986_v13 = vmax.f32 %v4228_v40, 0.0 }
 0x20b   :  { %v2987_v30 = vmax.f32 %v4229_v23, 0.0  ;;  %4153 = vmatprep.subr.bf16.mxu1 %v4792_v20 }
 0x20c   :  { %v2993_v45 = vpack.c.bf16 %v2986_v13, %v2986_v13 }
 0x20d   :  { %v2994_v32 = vpack.c.bf16 %v2987_v30, %v2987_v30 }
 0x20e   :  { %4154 = vmatpush3.bf16.msra.mxu1 %v4793_v58  ;;  %v547_v58 = vsub.s32 4, %v5074_v6 }
 0x20f   :  { %3525 = vmatprep.mubr.bf16.mxu1 %v2994_v32  ;;  %4155 = vmatprep.subr.bf16.mxu1 %v4794_v31  ;;  %v5177_v35 = vpop.f32.mrb[8].mxu1  ;;  %v552_v31 = vrot.slane %v5162_v29, %v551_v28 }
 0x210   :  { %v5179_v36 = vpop.f32.mrb[9].mxu1  ;;  %v548_v30 = vrot.slane %v5162_v29, %v547_v58 }
 0x211   :  { %v2821_v14 = vpop.f32.mrb[10].mxu1 }
 0x212   :  { %4156 = vmatpush3.bf16.msra.mxu1 %v4795_v33  ;;  %v2822_v39 = vpop.f32.mrb[11].mxu1 }
 0x213   :  { %4157 = vmatprep.subr.bf16.mxu1 %v4796_v63 }
 0x216   :  { %4158 = vmatpush3.bf16.msra.mxu1 %v4797_v38 }
 0x217   :  { %4159 = vmatprep.subr.bf16.mxu1 %v4798_v41 }
 0x21a   :  { %4160 = vmatpush3.bf16.msra.mxu1 %v4799_v42 }
 0x21b   :  { %4167 = vmatprep.subr.bf16.mxu1 %v4808_v43 }
 0x21d   :  { %3526 = vmatmul.mubr.bf16.vlgmr.msra.gmra.mrb[32].mxu1 %v2993_v45 }
 0x21e   :  { %4168 = vmatpush3.bf16.msra.mxu1 %v4809_v44 }
 0x21f   :  { %4169 = vmatprep.subr.bf16.mxu1 %v4810_v46 }
 0x222   :  { %4170 = vmatpush3.bf16.msra.mxu1 %v4811_v48  ;;  %v3998_v48 = vld [vmem:[#allocation10] ss:$0 sm:$0xff] }
 0x223   :  { %4171 = vmatprep.subr.bf16.mxu1 %v4812_v49 }
 0x226   :  { %4172 = vmatpush3.bf16.msra.mxu1 %v4813_v50 }
 0x227   :  { %4173 = vmatprep.subr.bf16.mxu1 %v4814_v51 }
 0x22a   :  { %4174 = vmatpush3.bf16.msra.mxu1 %v4815_v52 }
 0x22b   :  { %4175 = vmatprep.subr.bf16.mxu1 %v4816_v53 }
 0x22e   :  { %4176 = vmatpush3.bf16.msra.mxu1 %v4817_v47 }
 0x22f   :  { %v4071_v55 = vpop.f32.mrb[12].mxu1  ;;  %4177 = vmatprep.subr.bf16.mxu1 %v4818_v54 }
 0x230   :  { %v4072_v56 = vpop.f32.mrb[13].mxu1 }
 0x231   :  { %v4073_v57 = vadd.f32 %v4072_v56, %v4071_v55  ;;  %v4074_v59 = vpop.f32.mrb[14].mxu1 }
 0x232   :  { %v4075_v60 = vpop.f32.mrb[15].mxu1  ;;  %4178 = vmatpush3.bf16.msra.mxu1 %v4819_v61 }
 0x233   :  { %4179 = vmatprep.subr.bf16.mxu1 %v4820_v62  ;;  %v2859_v26 = vadd.f32 %v4073_v57, %v556_v5 }
 0x236   :  { %4180 = vmatpush3.bf16.msra.mxu1 %v4821_v1  ;;  %v3615_v1 = vand.u32 127, %v92_v3 }
 0x237   :  { %4181 = vmatprep.subr.bf16.mxu1 %v4822_v2 }
 0x238   :  { %vm3616_vm2 = vcmp.lt.s32.totalorder %v3615_v1, 10 }
 0x23a   :  { %4182 = vmatpush3.bf16.msra.mxu1 %v4823_v24 }
 0x24f   :  { %v4093_v7 = vpop.f32.mrb[16].mxu1 }
 0x250   :  { %v4094_v12 = vpop.f32.mrb[17].mxu1 }
 0x251   :  { %v4095_v8 = vadd.f32 %v4094_v12, %v4093_v7  ;;  %v4096_v37 = vpop.f32.mrb[18].mxu1 }
 0x252   :  { %v4097_v9 = vpop.f32.mrb[19].mxu1 }
 0x253   :  { %v2899_v10 = vadd.f32 %v4095_v8, %v2859_v26 }
 0x26f   :  { %v4115_v11 = vpop.f32.mrb[20].mxu1 }
 0x270   :  { %v4116_v16 = vpop.f32.mrb[21].mxu1 }
 0x271   :  { %v4117_v21 = vadd.f32 %v4116_v16, %v4115_v11  ;;  %v4118_v19 = vpop.f32.mrb[22].mxu1 }
 0x272   :  { %v4119_v15 = vpop.f32.mrb[23].mxu1 }
 0x273   :  { %v2939_v17 = vadd.f32 %v4117_v21, %v2899_v10 }
 0x277   :  { %v2978_v18 = vpop.f32.mrb[24].mxu1 }
 0x278   :  { %v2979_v0 = vadd.f32 %v2978_v18, %v2939_v17  ;;  %v4202_v20 = vpop.f32.mrb[25].mxu1 }
 0x279   :  { %v2981_v22 = vpop.f32.mrb[26].mxu1 }
 0x27a   :  { %v2990_v23 = vmax.f32 %v2979_v0, 0.0  ;;  %v4203_v25 = vpop.f32.mrb[27].mxu1 }
 0x27c   :  { %v2997_v27 = vpack.c.bf16 %v2990_v23, %v2990_v23 }
 0x27e   :  { %4221 = vmatmul.mubr.bf16.vlgmr.msra.gmra.mrb[8].mxu0 %v2997_v27 }
 0x2b2   :  { %v2776_v32 = vpop.f32.mrb[4].mxu0 }
 0x2b3   :  { %v4230_v33 = vadd.f32 %v2776_v32, %v548_v30  ;;  %v2778_v34 = vpop.f32.mrb[5].mxu0 }
 0x2b4   :  { %v4232_v63 = vadd.f32 %v2778_v34, %v552_v31  ;;  %v2780_v14 = vpop.f32.mrb[6].mxu0 }
 0x2b5   :  { %v4231_v38 = vadd.f32 %v4230_v33, %v5177_v35  ;;  %v2781_v39 = vpop.f32.mrb[7].mxu0 }
 0x2b6   :  { %v4233_v40 = vadd.f32 %v4232_v63, %v5179_v36 }
 0x2b7   :  { %v2988_v41 = vmax.f32 %v4231_v38, 0.0 }
 0x2b8   :  { %v2989_v42 = vmax.f32 %v4233_v40, 0.0 }
 0x2b9   :  { %v2995_v43 = vpack.c.bf16 %v2988_v41, %v2988_v41 }
 0x2ba   :  { %v2996_v13 = vpack.c.bf16 %v2989_v42, %v2989_v42 }
 0x2bc   :  { %3565 = vmatprep.mubr.bf16.mxu1 %v2996_v13 }
 0x2bd   :  { %3566 = vmatmul.mubr.bf16.vlgmr.msra.gmra.mrb[36].mxu1 %v2995_v43 }
 0x2d0   :  { %v4139_v6 = vpop.f32.mrb[28].mxu1 }
 0x2d1   :  { %v4140_v44 = vpop.f32.mrb[29].mxu1 }
 0x2d2   :  { %v4141_v45 = vadd.f32 %v4140_v44, %v4139_v6  ;;  %v4142_v29 = vpop.f32.mrb[30].mxu1 }
 0x2d3   :  { %v4143_v46 = vpop.f32.mrb[31].mxu1 }
 0x2d4   :  { %v3488_v51 = vadd.f32 %v4141_v45, %v3998_v48 }
 0x2f0   :  { %v4161_v49 = vpop.f32.mrb[32].mxu1 }
 0x2f1   :  { %v4162_v50 = vpop.f32.mrb[33].mxu1 }
 0x2f2   :  { %v4163_v52 = vadd.f32 %v4162_v50, %v4161_v49  ;;  %v4164_v35 = vpop.f32.mrb[34].mxu1 }
 0x2f3   :  { %v4165_v53 = vpop.f32.mrb[35].mxu1 }
 0x2f4   :  { %v3528_v47 = vadd.f32 %v4163_v52, %v3488_v51 }
 0x351   :  { %v3607_v36 = vpop.f32.mrb[8].mxu0 }
 0x352   :  { %v4222_v54 = vpop.f32.mrb[9].mxu0 }
 0x353   :  { %v3610_v55 = vpop.f32.mrb[10].mxu0 }
 0x354   :  { %v4223_v56 = vpop.f32.mrb[11].mxu0 }
 0x390   :  { %v4183_v57 = vpop.f32.mrb[36].mxu1 }
 0x391   :  { %v4184_v59 = vpop.f32.mrb[37].mxu1 }
 0x392   :  { %v4185_v60 = vadd.f32 %v4184_v59, %v4183_v57  ;;  %v4186_v61 = vpop.f32.mrb[38].mxu1 }
 0x393   :  { %v4187_v62 = vpop.f32.mrb[39].mxu1 }
 0x394   :  { %v3568_v2 = vadd.f32 %v4185_v60, %v3528_v47 }
 0x396   :  { %v3608_v24 = vadd.f32 %v3607_v36, %v3568_v2 }
 0x398   :  { %v3613_v4 = vmax.f32 %v3608_v24, 0.0 }
 0x39a   :  { %v3617_v5 = vsel %vm3616_vm2, %v3613_v4, -1e+30 }
 0x39b   :  { %v3619_v26 = vsel %vm3618_vm3, %v3617_v5, -inf }
 0x39c   :  { %3620 = vmax.xlane.f32.xlu0 %v3619_v26 }
 0x429   :  { %v3621_v7 = vpop.xlane.xlu0 %3620 }
 0x42a   :  { %v3622_v12 = vsub.f32 %v3617_v5, %v3621_v7 }
 0x42c   :  { %v3623_v8 = vmul.f32 1.442695, %v3622_v12 }
 0x42e   :  { %4824 = vpow2.f32 %v3623_v8 }
 0x438   :  { %v4825_v37 = vpop.eup %4824 }
 0x439   :  { %v3625_v9 = vsel %vm3618_vm3, %v4825_v37, 0.0 }
 0x43a   :  { %3626 = vadd.xlane.f32.xlu0 %v3625_v9 }
 0x4c7   :  { %v3627_v10 = vpop.xlane.xlu0 %3626 }
 0x4c8   :  { %4826 = vrcp.f32 %v3627_v10 }
 0x4d2   :  { %v4827_v11 = vpop.eup %4826 }
 0x4d3   :  { %v3629_v16 = vmul.f32 %v4827_v11, %v3627_v10 }
 0x4d5   :  { %v3630_v3 = vsub.f32 2.0, %v3629_v16 }
 0x4d7   :  { %v3631_v21 = vmul.f32 %v4827_v11, %v3630_v3 }
 0x4d9   :  { %v3632_v19 = vmul.f32 %v4825_v37, %v3631_v21 }
 0x4db   :  { %3633 = vst [vmem:[#allocation11] sm:$0x3] %v3632_v19 }
 0x4dc   :  { %4949 = shalt.err (!%p4946_p2)
}
 0x4dd   :  { %s4950_s7 = scalar_lea.hbm %s5207_s5, 32 }
 0x4de   :  { %p4951_p3 = scmp.ne.s32.totalorder %s5207_s5, %s4950_s7  ;;  %p4954_p4 = scmp.lt.u32.totalorder %s4950_s7, %s5207_s5 }
 0x4e0   :  { %p4956_p5 = pnand %p4954_p4, %p4951_p3 }
 0x4e2   :  { %4959 = shalt.err (!%p4956_p5)
}
 0x4e3   :  { %3643 = dma.vmem_to_hbm [thread:$0]  %s3641_s29, 32, %s5207_s5, [#allocation4]  }
 0x4e4   :  { %4966 = dma.done.wait [#allocation4], 32  }
 0x4e5   :  { %4967 = vsyncadd [#allocation4], 4294967264 }
 0x4e6   :  { %3647 = vsyncpa [#allocation3], 1 }
 0x4e7   :  { %3648 = vsyncpa [#allocation6], 1 }
 0x4e8   :  { %3649 = vsyncpa [#allocation9], 1 }
 0x4e9   :  { %3650 = vsyncpa [#allocation4], 1 }

</bundles_post_ra>
